<compile_context>
chip_gen: v7x
topology: tpu7x:2x2x1
jax: 0.10.0
libtpu: 0.0.40
codegen_flags: <defaults>
</compile_context>

<pallas_src>
import functools

import jax
import jax.numpy as jnp
import numpy as np
from jax.experimental import pallas as pl
from jax.experimental.pallas import tpu as pltpu


def _inverted_residual_kernel(x_ref, w1_ref, s1_ref, b1_ref, dw_ref, s2_ref,
                              b2_ref, w3_ref, s3_ref, b3_ref, o_ref,
                              *, stride, use_res, th, h_true):
    # x_ref : (Hp, W, C)        f32  whole H-padded image (resident across strips)
    # o_ref : (th, WO, oup_p)   f32  one output row-strip, lane-padded channels
    t = pl.program_id(1)
    ih = (th - 1) * stride + 3                   # input rows this strip needs
    hid = w1_ref.shape[1]                        # lane-padded expanded channels
    oup_p = o_ref.shape[-1]                      # lane-padded output channels
    w_in = x_ref.shape[1]
    c_in = x_ref.shape[2]
    wo = o_ref.shape[1]

    row0 = pl.multiple_of(t * (th * stride), th * stride)
    xs = x_ref[pl.ds(row0, ih)]                  # (ih, W, C): strip + 3x3 halo

    # ---- 1x1 expand conv + folded BN + ReLU6 (pointwise conv == channel matmul).
    # K == c_in is tiny, so this dot stays f32 (MXU utilization is irrelevant here).
    hx = jnp.dot(xs.reshape(ih * w_in, c_in), w1_ref[...],
                 preferred_element_type=jnp.float32)          # (ih*W, hid)
    hx = jnp.clip(hx * s1_ref[...] + b1_ref[...], 0.0, 6.0)
    hx = hx.reshape(ih, w_in, hid)

    # Rows that come from the 3x3 conv's zero padding must be zero *after* the
    # expand (the conv pads h, not x).
    grow = row0 + jax.lax.broadcasted_iota(jnp.int32, (ih, 1, 1), 0)
    hx = jnp.where((grow >= 1) & (grow <= h_true), hx, 0.0)

    dwv = dw_ref[...]                            # (3, 3, hid): loaded/hoisted once

    # ---- 3x3 depthwise conv: column shifts via XLU roll + edge masks ----
    if stride == 1:
        col = jax.lax.broadcasted_iota(jnp.int32, (1, w_in, 1), 1)

        def g_of(dj):                            # g[dj][r, j] == h_padded[r, j + dj]
            if dj == 0:
                return jnp.where(col >= 1, pltpu.roll(hx, 1, axis=1), 0.0)
            if dj == 1:
                return hx
            return jnp.where(col <= w_in - 2,
                             pltpu.roll(hx, w_in - 1, axis=1), 0.0)

        def taps_of(g):                          # rows di, di+1, ..., di+th-1
            return [g[di:di + th] for di in range(3)]
    else:
        # Wrapper pre-permuted W to [even cols..., odd cols...]; no strided
        # sublane reads are needed in the kernel.
        h_even = hx[:, :wo, :]
        h_odd = hx[:, wo:, :]
        col = jax.lax.broadcasted_iota(jnp.int32, (1, wo, 1), 1)

        def g_of(dj):
            if dj == 0:                          # col 2j-1 -> odd cols shifted by 1
                return jnp.where(col >= 1, pltpu.roll(h_odd, 1, axis=1), 0.0)
            if dj == 1:                          # col 2j   -> even cols
                return h_even
            return h_odd                         # col 2j+1 -> odd cols

        def taps_of(g):                          # rows di, di+2, ..., di+2*(th-1)
            ge = g[:2 * th].reshape(th, 2, wo, hid)
            go = g[1:2 * th + 1].reshape(th, 2, wo, hid)
            return [ge[:, 0], ge[:, 1], go[:, 1]]

    acc = jnp.zeros((th, wo, hid), jnp.float32)
    for dj in range(3):
        taps = taps_of(g_of(dj))                 # one W-shift per dj, reused over di
        for di in range(3):
            acc = acc + taps[di] * dwv[di:di + 1, dj:dj + 1, :]

    h2 = jnp.clip(acc.reshape(th * wo, hid) * s2_ref[...] + b2_ref[...], 0.0, 6.0)

    # ---- 1x1 project conv + folded BN (bf16 operands on the MXU, f32 accum) ----
    out = jnp.dot(h2.astype(jnp.bfloat16), w3_ref[...],
                  preferred_element_type=jnp.float32)         # (th*WO, oup_p)
    out = out * s3_ref[...] + b3_ref[...]
    o_ref[...] = out.reshape(th, wo, oup_p).astype(o_ref.dtype)

    if use_res:                                  # stride == 1 and inp == oup
        res = x_ref[pl.ds(row0 + 1, th)]         # (th, W, C): this strip's input rows
        o_ref[:, :, :c_in] = o_ref[:, :, :c_in] + res


def _round_up(v, m):
    return (v + m - 1) // m * m


def _pad_last(a, n):
    if a.shape[-1] == n:
        return a
    cfg = [(0, 0)] * (a.ndim - 1) + [(0, n - a.shape[-1])]
    return jnp.pad(a, cfg)


def _pick_strip_height(ho, target=8):
    """Largest divisor of HO that is <= target (avoids ragged output blocks)."""
    th = min(ho, target)
    while ho % th:
        th -= 1
    return th


def inverted_residual_nhwc(x_nhwc, params, *, stride):
    """NHWC in / NHWC out.  Prefer this entry point when chaining blocks so
    activations never round-trip through NCHW transposes."""
    B, H, W, C = x_nhwc.shape
    hid = params["w1"].shape[1]
    oup = params["w3"].shape[1]
    use_res = (stride == 1) and (C == oup)
    if stride == 2 and (H % 2 or W % 2):
        # TODO(synk): odd spatial dims with stride=2 (not used by MobileNetV2).
        raise NotImplementedError("stride=2 path assumes even H and W")

    HO = (H - 1) // stride + 1
    WO = (W - 1) // stride + 1

    hid_p = _round_up(hid, 128)
    oup_p = _round_up(oup, 128)

    # Lane-pad folded weights (do this once at model load in a real network).
    w1 = _pad_last(params["w1"], hid_p).astype(jnp.float32)
    s1 = _pad_last(params["s1"], hid_p)
    b1 = _pad_last(params["b1"], hid_p)
    dw = _pad_last(params["dw"], hid_p)
    s2 = _pad_last(params["s2"], hid_p)
    b2 = _pad_last(params["b2"], hid_p)
    w3 = _pad_last(jnp.pad(params["w3"], ((0, hid_p - hid), (0, 0))), oup_p)
    w3 = w3.astype(jnp.bfloat16)                 # big matmul RHS in bf16
    s3 = _pad_last(params["s3"], oup_p)
    b3 = _pad_last(params["b3"], oup_p)

    x = x_nhwc.astype(jnp.float32)
    xp = jnp.pad(x, ((0, 0), (1, 1), (0, 0), (0, 0)))      # zero-pad H for the 3x3 halo
    if stride == 2:
        perm = jnp.concatenate([jnp.arange(0, W, 2), jnp.arange(1, W, 2)])
        xp = xp[:, :, perm, :]                             # [even cols..., odd cols...]

    TH = _pick_strip_height(HO)
    NT = HO // TH
    Hp = H + 2
    assert (NT * TH - 1) * stride + 3 <= Hp

    kernel = functools.partial(_inverted_residual_kernel, stride=stride,
                               use_res=use_res, th=TH, h_true=H)

    out_p = pl.pallas_call(
        kernel,
        out_shape=jax.ShapeDtypeStruct((B, HO, WO, oup_p), jnp.float32),
        grid=(B, NT),
        in_specs=[
            # Whole padded image per batch element: index depends only on b, so
            # it stays resident (one DMA) across all row-strips of that image.
            pl.BlockSpec((None, Hp, W, C), lambda b, t: (b, 0, 0, 0)),
            pl.BlockSpec((C, hid_p), lambda b, t: (0, 0)),
            pl.BlockSpec((1, hid_p), lambda b, t: (0, 0)),
            pl.BlockSpec((1, hid_p), lambda b, t: (0, 0)),
            pl.BlockSpec((3, 3, hid_p), lambda b, t: (0, 0, 0)),
            pl.BlockSpec((1, hid_p), lambda b, t: (0, 0)),
            pl.BlockSpec((1, hid_p), lambda b, t: (0, 0)),
            pl.BlockSpec((hid_p, oup_p), lambda b, t: (0, 0)),
            pl.BlockSpec((1, oup_p), lambda b, t: (0, 0)),
            pl.BlockSpec((1, oup_p), lambda b, t: (0, 0)),
        ],
        out_specs=pl.BlockSpec((None, TH, WO, oup_p), lambda b, t: (b, t, 0, 0)),
        compiler_params=pltpu.CompilerParams(
            dimension_semantics=("parallel", "parallel"),
            vmem_limit_bytes=32 * 1024 * 1024),
    )(xp, w1, s1, b1, dw, s2, b2, w3, s3, b3)

    return out_p[..., :oup]


@functools.partial(jax.jit, static_argnames=("stride",))
def inverted_residual(x_nchw, params, *, stride):
    """NCHW compatibility wrapper matching the PyTorch module's layout.  In a
    real network keep activations NHWC end-to-end (inverted_residual_nhwc) and
    skip these two transpose passes."""
    x = jnp.transpose(x_nchw, (0, 2, 3, 1))
    out = inverted_residual_nhwc(x, params, stride=stride)
    return jnp.transpose(out, (0, 3, 1, 2))


def make_params(key, inp, oup, expand_ratio, eps=1e-5):
    """Deterministic synthetic weights; BN folded into (scale, bias)."""
    hid = inp * expand_ratio
    ks = jax.random.split(key, 15)

    def folded_bn(kg, kb, km, kv, c):
        gamma = 1.0 + 0.1 * jax.random.normal(kg, (c,), jnp.float32)
        beta = 0.1 * jax.random.normal(kb, (c,), jnp.float32)
        mean = 0.1 * jax.random.normal(km, (c,), jnp.float32)
        var = jax.random.uniform(kv, (c,), jnp.float32, 0.5, 1.5)
        scale = gamma / jnp.sqrt(var + eps)
        bias = beta - mean * scale
        return scale.reshape(1, c), bias.reshape(1, c)

    w1 = 0.3 * jax.random.normal(ks[0], (inp, hid), jnp.float32)   # 1x1 expand
    dw = 0.3 * jax.random.normal(ks[1], (3, 3, hid), jnp.float32)  # 3x3 depthwise
    w3 = 0.3 * jax.random.normal(ks[2], (hid, oup), jnp.float32)   # 1x1 project
    s1, b1 = folded_bn(ks[3], ks[4], ks[5], ks[6], hid)
    s2, b2 = folded_bn(ks[7], ks[8], ks[9], ks[10], hid)
    s3, b3 = folded_bn(ks[11], ks[12], ks[13], ks[14], oup)
    return dict(w1=w1, s1=s1, b1=b1, dw=dw, s2=s2, b2=b2, w3=w3, s3=s3, b3=b3)


def ref_forward(x_nchw, p, *, stride):
    """Pure-JAX reference (same math, independent of the kernel)."""
    x = jnp.transpose(x_nchw, (0, 2, 3, 1))
    hid, oup = p["w1"].shape[1], p["w3"].shape[1]
    use_res = (stride == 1) and (x_nchw.shape[1] == oup)
    h = jnp.einsum("bhwc,ck->bhwk", x, p["w1"])
    h = jnp.clip(h * p["s1"] + p["b1"], 0.0, 6.0)
    dwk = p["dw"].reshape(3, 3, 1, hid)
    h2 = jax.lax.conv_general_dilated(
        h, dwk, window_strides=(stride, stride), padding=((1, 1), (1, 1)),
        dimension_numbers=("NHWC", "HWIO", "NHWC"), feature_group_count=hid)
    h2 = jnp.clip(h2 * p["s2"] + p["b2"], 0.0, 6.0)
    out = jnp.einsum("bhwk,ko->bhwo", h2, p["w3"])
    out = out * p["s3"] + p["b3"]
    if use_res:
        out = out + x
    return jnp.transpose(out, (0, 3, 1, 2))


def _check(name, x, params, stride):
    out = jax.block_until_ready(inverted_residual(x, params, stride=stride))
    ref = jax.block_until_ready(ref_forward(x, params, stride=stride))
    if out.shape != ref.shape:
        raise AssertionError(f"{name}: shape mismatch {out.shape} vs {ref.shape}")
    # Tolerance sized for the bf16 MXU operands of the project matmul.
    if not np.allclose(np.asarray(out), np.asarray(ref), atol=1e-1, rtol=5e-2):
        err = float(np.max(np.abs(np.asarray(out) - np.asarray(ref))))
        raise AssertionError(f"{name}: kernel mismatch vs reference (max abs err {err})")


if __name__ == "__main__":
    key = jax.random.PRNGKey(0)
    kx1, kp1, kx2, kp2 = jax.random.split(key, 4)

    # stride=1, inp == oup  -> residual path
    B, H, W = 2, 16, 16
    x1 = jax.random.normal(kx1, (B, 4, H, W), jnp.float32)
    p1 = make_params(kp1, 4, 4, expand_ratio=6)
    _check("stride1", x1, p1, stride=1)

    # stride=2, inp != oup  -> no residual, spatial downsample
    x2 = jax.random.normal(kx2, (B, 4, H, W), jnp.float32)
    p2 = make_params(kp2, 4, 8, expand_ratio=6)
    _check("stride2", x2, p2, stride=2)

    print("KERNEL_OK")
</pallas_src>

<mosaic_0001>
module attributes {stable_mosaic.version = 11 : i64} {
  func.func @_inverted_residual_kernel(%arg0: i32, %arg1: i32, %arg2: memref<1x18x16x4xf32, #tpu.memory_space<vmem>>, %arg3: memref<4x128xf32, #tpu.memory_space<vmem>>, %arg4: memref<1x128xf32, #tpu.memory_space<vmem>>, %arg5: memref<1x128xf32, #tpu.memory_space<vmem>>, %arg6: memref<3x3x128xf32, #tpu.memory_space<vmem>>, %arg7: memref<1x128xf32, #tpu.memory_space<vmem>>, %arg8: memref<1x128xf32, #tpu.memory_space<vmem>>, %arg9: memref<128x128xbf16, #tpu.memory_space<vmem>>, %arg10: memref<1x128xf32, #tpu.memory_space<vmem>>, %arg11: memref<1x128xf32, #tpu.memory_space<vmem>>, %arg12: memref<1x8x16x128xf32, #tpu.memory_space<vmem>>) attributes {dimension_semantics = [#tpu.dimension_semantics<parallel>, #tpu.dimension_semantics<parallel>], iteration_bounds = array<i64: 2, 2>, scalar_prefetch = 0 : i64, scratch_operands = 0 : i64, tpu.core_type = #tpu.core_type<tc>, window_params = [{transform_indices = @transform_0, window_bounds = array<i64: 1, 18, 16, 4>}, {pipeline_mode = #tpu.pipeline_mode<synchronous>, transform_indices = @transform_1, window_bounds = array<i64: 4, 128>}, {pipeline_mode = #tpu.pipeline_mode<synchronous>, transform_indices = @transform_2, window_bounds = array<i64: 1, 128>}, {pipeline_mode = #tpu.pipeline_mode<synchronous>, transform_indices = @transform_3, window_bounds = array<i64: 1, 128>}, {pipeline_mode = #tpu.pipeline_mode<synchronous>, transform_indices = @transform_4, window_bounds = array<i64: 3, 3, 128>}, {pipeline_mode = #tpu.pipeline_mode<synchronous>, transform_indices = @transform_5, window_bounds = array<i64: 1, 128>}, {pipeline_mode = #tpu.pipeline_mode<synchronous>, transform_indices = @transform_6, window_bounds = array<i64: 1, 128>}, {pipeline_mode = #tpu.pipeline_mode<synchronous>, transform_indices = @transform_7, window_bounds = array<i64: 128, 128>}, {pipeline_mode = #tpu.pipeline_mode<synchronous>, transform_indices = @transform_8, window_bounds = array<i64: 1, 128>}, {pipeline_mode = #tpu.pipeline_mode<synchronous>, transform_indices = @transform_9, window_bounds = array<i64: 1, 128>}, {transform_indices = @transform_10, window_bounds = array<i64: 1, 8, 16, 128>}]} {
    %c8_i32 = arith.constant 8 : i32
    %0 = arith.muli %arg1, %c8_i32 : i32
    %1 = tpu.assume_multiple %0, 8 : i32
    %c0 = arith.constant 0 : index
    %2 = arith.index_cast %1 : i32 to index
    %c0_0 = arith.constant 0 : index
    %c0_1 = arith.constant 0 : index
    %3 = vector.load %arg2[%c0, %2, %c0_0, %c0_1] : memref<1x18x16x4xf32, #tpu.memory_space<vmem>>, vector<1x10x16x4xf32>
    %4 = vector.shape_cast %3 : vector<1x10x16x4xf32> to vector<10x16x4xf32>
    %5 = vector.shape_cast %4 : vector<10x16x4xf32> to vector<160x4xf32>
    %c0_2 = arith.constant 0 : index
    %c0_3 = arith.constant 0 : index
    %6 = vector.load %arg3[%c0_2, %c0_3] : memref<4x128xf32, #tpu.memory_space<vmem>>, vector<4x128xf32>
    %cst = arith.constant dense<0.000000e+00> : vector<160x128xf32>
    %7 = tpu.matmul %5, %6, %cst {dimension_numbers = #tpu.dot_dimension_numbers<[1], [0], [0], [1], [0, 0, 1, 1], [], []>} : vector<160x4xf32>, vector<4x128xf32>, vector<160x128xf32> -> vector<160x128xf32>
    %c0_4 = arith.constant 0 : index
    %c0_5 = arith.constant 0 : index
    %8 = vector.load %arg4[%c0_4, %c0_5] : memref<1x128xf32, #tpu.memory_space<vmem>>, vector<1x128xf32>
    %9 = vector.broadcast %8 : vector<1x128xf32> to vector<160x128xf32>
    %10 = arith.mulf %7, %9 : vector<160x128xf32>
    %c0_6 = arith.constant 0 : index
    %c0_7 = arith.constant 0 : index
    %11 = vector.load %arg5[%c0_6, %c0_7] : memref<1x128xf32, #tpu.memory_space<vmem>>, vector<1x128xf32>
    %12 = vector.broadcast %11 : vector<1x128xf32> to vector<160x128xf32>
    %13 = arith.addf %10, %12 : vector<160x128xf32>
    %cst_8 = arith.constant 0.000000e+00 : f32
    %cst_9 = arith.constant 6.000000e+00 : f32
    %14 = vector.broadcast %cst_8 : f32 to vector<160x128xf32>
    %15 = arith.maximumf %14, %13 : vector<160x128xf32>
    %16 = vector.broadcast %cst_9 : f32 to vector<160x128xf32>
    %17 = arith.minimumf %16, %15 : vector<160x128xf32>
    %18 = vector.shape_cast %17 : vector<160x128xf32> to vector<10x16x128xf32>
    %19 = tpu.iota {dimensions = array<i32: 0>} : vector<10x1x1xi32>
    %20 = vector.broadcast %1 : i32 to vector<10x1x1xi32>
    %21 = arith.addi %20, %19 : vector<10x1x1xi32>
    %c1_i32 = arith.constant 1 : i32
    %22 = vector.broadcast %c1_i32 : i32 to vector<10x1x1xi32>
    %23 = arith.cmpi sge, %21, %22 : vector<10x1x1xi32>
    %c16_i32 = arith.constant 16 : i32
    %24 = vector.broadcast %c16_i32 : i32 to vector<10x1x1xi32>
    %25 = arith.cmpi sle, %21, %24 : vector<10x1x1xi32>
    %26 = arith.andi %23, %25 : vector<10x1x1xi1>
    %cst_10 = arith.constant 0.000000e+00 : f32
    %27 = vector.shape_cast %26 : vector<10x1x1xi1> to vector<10x1x1xi1>
    %28 = vector.broadcast %27 : vector<10x1x1xi1> to vector<10x16x128xi1>
    %29 = vector.broadcast %cst_10 : f32 to vector<10x16x128xf32>
    %30 = arith.select %28, %18, %29 : vector<10x16x128xi1>, vector<10x16x128xf32>
    %c0_11 = arith.constant 0 : index
    %c0_12 = arith.constant 0 : index
    %c0_13 = arith.constant 0 : index
    %31 = vector.load %arg6[%c0_11, %c0_12, %c0_13] : memref<3x3x128xf32, #tpu.memory_space<vmem>>, vector<3x3x128xf32>
    %32 = tpu.iota {dimensions = array<i32: 1>} : vector<1x16x1xi32>
    %cst_14 = arith.constant 0.000000e+00 : f32
    %33 = vector.broadcast %cst_14 : f32 to vector<8x16x128xf32>
    %c1_i32_15 = arith.constant 1 : i32
    %34 = vector.broadcast %c1_i32_15 : i32 to vector<1x16x1xi32>
    %35 = arith.cmpi sge, %32, %34 : vector<1x16x1xi32>
    %c1_i32_16 = arith.constant 1 : i32
    %36 = tpu.dynamic_rotate %30 by %c1_i32_16 dim 1 : vector<10x16x128xf32>, i32 -> vector<10x16x128xf32>
    %cst_17 = arith.constant 0.000000e+00 : f32
    %37 = vector.shape_cast %35 : vector<1x16x1xi1> to vector<1x16x1xi1>
    %38 = vector.broadcast %37 : vector<1x16x1xi1> to vector<10x16x128xi1>
    %39 = vector.broadcast %cst_17 : f32 to vector<10x16x128xf32>
    %40 = arith.select %38, %36, %39 : vector<10x16x128xi1>, vector<10x16x128xf32>
    %41 = vector.extract_strided_slice %40 {offsets = [0, 0, 0], sizes = [8, 16, 128], strides = [1, 1, 1]} : vector<10x16x128xf32> to vector<8x16x128xf32>
    %42 = vector.extract_strided_slice %40 {offsets = [1, 0, 0], sizes = [8, 16, 128], strides = [1, 1, 1]} : vector<10x16x128xf32> to vector<8x16x128xf32>
    %43 = vector.extract_strided_slice %40 {offsets = [2, 0, 0], sizes = [8, 16, 128], strides = [1, 1, 1]} : vector<10x16x128xf32> to vector<8x16x128xf32>
    %44 = vector.extract_strided_slice %31 {offsets = [0, 0, 0], sizes = [1, 1, 128], strides = [1, 1, 1]} : vector<3x3x128xf32> to vector<1x1x128xf32>
    %45 = vector.broadcast %44 : vector<1x1x128xf32> to vector<8x16x128xf32>
    %46 = arith.mulf %41, %45 : vector<8x16x128xf32>
    %47 = arith.addf %33, %46 : vector<8x16x128xf32>
    %48 = vector.extract_strided_slice %31 {offsets = [1, 0, 0], sizes = [1, 1, 128], strides = [1, 1, 1]} : vector<3x3x128xf32> to vector<1x1x128xf32>
    %49 = vector.broadcast %48 : vector<1x1x128xf32> to vector<8x16x128xf32>
    %50 = arith.mulf %42, %49 : vector<8x16x128xf32>
    %51 = arith.addf %47, %50 : vector<8x16x128xf32>
    %52 = vector.extract_strided_slice %31 {offsets = [2, 0, 0], sizes = [1, 1, 128], strides = [1, 1, 1]} : vector<3x3x128xf32> to vector<1x1x128xf32>
    %53 = vector.broadcast %52 : vector<1x1x128xf32> to vector<8x16x128xf32>
    %54 = arith.mulf %43, %53 : vector<8x16x128xf32>
    %55 = arith.addf %51, %54 : vector<8x16x128xf32>
    %56 = vector.extract_strided_slice %30 {offsets = [0, 0, 0], sizes = [8, 16, 128], strides = [1, 1, 1]} : vector<10x16x128xf32> to vector<8x16x128xf32>
    %57 = vector.extract_strided_slice %30 {offsets = [1, 0, 0], sizes = [8, 16, 128], strides = [1, 1, 1]} : vector<10x16x128xf32> to vector<8x16x128xf32>
    %58 = vector.extract_strided_slice %30 {offsets = [2, 0, 0], sizes = [8, 16, 128], strides = [1, 1, 1]} : vector<10x16x128xf32> to vector<8x16x128xf32>
    %59 = vector.extract_strided_slice %31 {offsets = [0, 1, 0], sizes = [1, 1, 128], strides = [1, 1, 1]} : vector<3x3x128xf32> to vector<1x1x128xf32>
    %60 = vector.broadcast %59 : vector<1x1x128xf32> to vector<8x16x128xf32>
    %61 = arith.mulf %56, %60 : vector<8x16x128xf32>
    %62 = arith.addf %55, %61 : vector<8x16x128xf32>
    %63 = vector.extract_strided_slice %31 {offsets = [1, 1, 0], sizes = [1, 1, 128], strides = [1, 1, 1]} : vector<3x3x128xf32> to vector<1x1x128xf32>
    %64 = vector.broadcast %63 : vector<1x1x128xf32> to vector<8x16x128xf32>
    %65 = arith.mulf %57, %64 : vector<8x16x128xf32>
    %66 = arith.addf %62, %65 : vector<8x16x128xf32>
    %67 = vector.extract_strided_slice %31 {offsets = [2, 1, 0], sizes = [1, 1, 128], strides = [1, 1, 1]} : vector<3x3x128xf32> to vector<1x1x128xf32>
    %68 = vector.broadcast %67 : vector<1x1x128xf32> to vector<8x16x128xf32>
    %69 = arith.mulf %58, %68 : vector<8x16x128xf32>
    %70 = arith.addf %66, %69 : vector<8x16x128xf32>
    %c14_i32 = arith.constant 14 : i32
    %71 = vector.broadcast %c14_i32 : i32 to vector<1x16x1xi32>
    %72 = arith.cmpi sle, %32, %71 : vector<1x16x1xi32>
    %c15_i32 = arith.constant 15 : i32
    %73 = tpu.dynamic_rotate %30 by %c15_i32 dim 1 : vector<10x16x128xf32>, i32 -> vector<10x16x128xf32>
    %cst_18 = arith.constant 0.000000e+00 : f32
    %74 = vector.shape_cast %72 : vector<1x16x1xi1> to vector<1x16x1xi1>
    %75 = vector.broadcast %74 : vector<1x16x1xi1> to vector<10x16x128xi1>
    %76 = vector.broadcast %cst_18 : f32 to vector<10x16x128xf32>
    %77 = arith.select %75, %73, %76 : vector<10x16x128xi1>, vector<10x16x128xf32>
    %78 = vector.extract_strided_slice %77 {offsets = [0, 0, 0], sizes = [8, 16, 128], strides = [1, 1, 1]} : vector<10x16x128xf32> to vector<8x16x128xf32>
    %79 = vector.extract_strided_slice %77 {offsets = [1, 0, 0], sizes = [8, 16, 128], strides = [1, 1, 1]} : vector<10x16x128xf32> to vector<8x16x128xf32>
    %80 = vector.extract_strided_slice %77 {offsets = [2, 0, 0], sizes = [8, 16, 128], strides = [1, 1, 1]} : vector<10x16x128xf32> to vector<8x16x128xf32>
    %81 = vector.extract_strided_slice %31 {offsets = [0, 2, 0], sizes = [1, 1, 128], strides = [1, 1, 1]} : vector<3x3x128xf32> to vector<1x1x128xf32>
    %82 = vector.broadcast %81 : vector<1x1x128xf32> to vector<8x16x128xf32>
    %83 = arith.mulf %78, %82 : vector<8x16x128xf32>
    %84 = arith.addf %70, %83 : vector<8x16x128xf32>
    %85 = vector.extract_strided_slice %31 {offsets = [1, 2, 0], sizes = [1, 1, 128], strides = [1, 1, 1]} : vector<3x3x128xf32> to vector<1x1x128xf32>
    %86 = vector.broadcast %85 : vector<1x1x128xf32> to vector<8x16x128xf32>
    %87 = arith.mulf %79, %86 : vector<8x16x128xf32>
    %88 = arith.addf %84, %87 : vector<8x16x128xf32>
    %89 = vector.extract_strided_slice %31 {offsets = [2, 2, 0], sizes = [1, 1, 128], strides = [1, 1, 1]} : vector<3x3x128xf32> to vector<1x1x128xf32>
    %90 = vector.broadcast %89 : vector<1x1x128xf32> to vector<8x16x128xf32>
    %91 = arith.mulf %80, %90 : vector<8x16x128xf32>
    %92 = arith.addf %88, %91 : vector<8x16x128xf32>
    %93 = vector.shape_cast %92 : vector<8x16x128xf32> to vector<128x128xf32>
    %c0_19 = arith.constant 0 : index
    %c0_20 = arith.constant 0 : index
    %94 = vector.load %arg7[%c0_19, %c0_20] : memref<1x128xf32, #tpu.memory_space<vmem>>, vector<1x128xf32>
    %95 = vector.broadcast %94 : vector<1x128xf32> to vector<128x128xf32>
    %96 = arith.mulf %93, %95 : vector<128x128xf32>
    %c0_21 = arith.constant 0 : index
    %c0_22 = arith.constant 0 : index
    %97 = vector.load %arg8[%c0_21, %c0_22] : memref<1x128xf32, #tpu.memory_space<vmem>>, vector<1x128xf32>
    %98 = vector.broadcast %97 : vector<1x128xf32> to vector<128x128xf32>
    %99 = arith.addf %96, %98 : vector<128x128xf32>
    %cst_23 = arith.constant 0.000000e+00 : f32
    %cst_24 = arith.constant 6.000000e+00 : f32
    %100 = vector.broadcast %cst_23 : f32 to vector<128x128xf32>
    %101 = arith.maximumf %100, %99 : vector<128x128xf32>
    %102 = vector.broadcast %cst_24 : f32 to vector<128x128xf32>
    %103 = arith.minimumf %102, %101 : vector<128x128xf32>
    %104 = arith.truncf %103 : vector<128x128xf32> to vector<128x128xbf16>
    %c0_25 = arith.constant 0 : index
    %c0_26 = arith.constant 0 : index
    %105 = vector.load %arg9[%c0_25, %c0_26] : memref<128x128xbf16, #tpu.memory_space<vmem>>, vector<128x128xbf16>
    %cst_27 = arith.constant dense<0.000000e+00> : vector<128x128xf32>
    %106 = tpu.matmul %104, %105, %cst_27 {dimension_numbers = #tpu.dot_dimension_numbers<[1], [0], [0], [1], [0, 0, 1, 1], [], []>} : vector<128x128xbf16>, vector<128x128xbf16>, vector<128x128xf32> -> vector<128x128xf32>
    %c0_28 = arith.constant 0 : index
    %c0_29 = arith.constant 0 : index
    %107 = vector.load %arg10[%c0_28, %c0_29] : memref<1x128xf32, #tpu.memory_space<vmem>>, vector<1x128xf32>
    %108 = vector.broadcast %107 : vector<1x128xf32> to vector<128x128xf32>
    %109 = arith.mulf %106, %108 : vector<128x128xf32>
    %c0_30 = arith.constant 0 : index
    %c0_31 = arith.constant 0 : index
    %110 = vector.load %arg11[%c0_30, %c0_31] : memref<1x128xf32, #tpu.memory_space<vmem>>, vector<1x128xf32>
    %111 = vector.broadcast %110 : vector<1x128xf32> to vector<128x128xf32>
    %112 = arith.addf %109, %111 : vector<128x128xf32>
    %113 = vector.shape_cast %112 : vector<128x128xf32> to vector<8x16x128xf32>
    %c0_32 = arith.constant 0 : index
    %c0_33 = arith.constant 0 : index
    %c0_34 = arith.constant 0 : index
    %c0_35 = arith.constant 0 : index
    %114 = vector.load %arg12[%c0_32, %c0_33, %c0_34, %c0_35] : memref<1x8x16x128xf32, #tpu.memory_space<vmem>>, vector<1x8x16x128xf32>
    %115 = vector.shape_cast %114 : vector<1x8x16x128xf32> to vector<8x16x128xf32>
    %116 = vector.shape_cast %113 : vector<8x16x128xf32> to vector<1x8x16x128xf32>
    tpu.vector_store %arg12[%c0_32, %c0_33, %c0_34, %c0_35], %116 {strides = array<i32>} : memref<1x8x16x128xf32, #tpu.memory_space<vmem>>, vector<1x8x16x128xf32>,
    %c1_i32_36 = arith.constant 1 : i32
    %117 = arith.addi %1, %c1_i32_36 : i32
    %c0_37 = arith.constant 0 : index
    %118 = arith.index_cast %117 : i32 to index
    %c0_38 = arith.constant 0 : index
    %c0_39 = arith.constant 0 : index
    %119 = vector.load %arg2[%c0_37, %118, %c0_38, %c0_39] : memref<1x18x16x4xf32, #tpu.memory_space<vmem>>, vector<1x8x16x4xf32>
    %120 = vector.shape_cast %119 : vector<1x8x16x4xf32> to vector<8x16x4xf32>
    %c0_40 = arith.constant 0 : index
    %c0_41 = arith.constant 0 : index
    %c0_42 = arith.constant 0 : index
    %c0_43 = arith.constant 0 : index
    %121 = vector.load %arg12[%c0_40, %c0_41, %c0_42, %c0_43] : memref<1x8x16x128xf32, #tpu.memory_space<vmem>>, vector<1x8x16x4xf32>
    %122 = vector.shape_cast %121 : vector<1x8x16x4xf32> to vector<8x16x4xf32>
    %123 = arith.addf %122, %120 : vector<8x16x4xf32>
    %c0_44 = arith.constant 0 : index
    %c0_45 = arith.constant 0 : index
    %c0_46 = arith.constant 0 : index
    %c0_47 = arith.constant 0 : index
    %124 = vector.load %arg12[%c0_44, %c0_45, %c0_46, %c0_47] : memref<1x8x16x128xf32, #tpu.memory_space<vmem>>, vector<1x8x16x4xf32>
    %125 = vector.shape_cast %124 : vector<1x8x16x4xf32> to vector<8x16x4xf32>
    %126 = vector.shape_cast %123 : vector<8x16x4xf32> to vector<1x8x16x4xf32>
    tpu.vector_store %arg12[%c0_44, %c0_45, %c0_46, %c0_47], %126 {strides = array<i32>} : memref<1x8x16x128xf32, #tpu.memory_space<vmem>>, vector<1x8x16x4xf32>,
    return
  }
  func.func @transform_0(%arg0: i32, %arg1: i32) -> (i32, i32, i32, i32) {
    %c0_i32 = arith.constant 0 : i32
    %c0_i32_0 = arith.constant 0 : i32
    %c0_i32_1 = arith.constant 0 : i32
    %c0_i32_2 = arith.constant 0 : i32
    return %arg0, %c0_i32, %c0_i32_0, %c0_i32_1 : i32, i32, i32, i32
  }
  func.func @transform_1(%arg0: i32, %arg1: i32) -> (i32, i32) {
    %c0_i32 = arith.constant 0 : i32
    %c0_i32_0 = arith.constant 0 : i32
    %c0_i32_1 = arith.constant 0 : i32
    return %c0_i32, %c0_i32_0 : i32, i32
  }
  func.func @transform_2(%arg0: i32, %arg1: i32) -> (i32, i32) {
    %c0_i32 = arith.constant 0 : i32
    %c0_i32_0 = arith.constant 0 : i32
    %c0_i32_1 = arith.constant 0 : i32
    return %c0_i32, %c0_i32_0 : i32, i32
  }
  func.func @transform_3(%arg0: i32, %arg1: i32) -> (i32, i32) {
    %c0_i32 = arith.constant 0 : i32
    %c0_i32_0 = arith.constant 0 : i32
    %c0_i32_1 = arith.constant 0 : i32
    return %c0_i32, %c0_i32_0 : i32, i32
  }
  func.func @transform_4(%arg0: i32, %arg1: i32) -> (i32, i32, i32) {
    %c0_i32 = arith.constant 0 : i32
    %c0_i32_0 = arith.constant 0 : i32
    %c0_i32_1 = arith.constant 0 : i32
    %c0_i32_2 = arith.constant 0 : i32
    return %c0_i32, %c0_i32_0, %c0_i32_1 : i32, i32, i32
  }
  func.func @transform_5(%arg0: i32, %arg1: i32) -> (i32, i32) {
    %c0_i32 = arith.constant 0 : i32
    %c0_i32_0 = arith.constant 0 : i32
    %c0_i32_1 = arith.constant 0 : i32
    return %c0_i32, %c0_i32_0 : i32, i32
  }
  func.func @transform_6(%arg0: i32, %arg1: i32) -> (i32, i32) {
    %c0_i32 = arith.constant 0 : i32
    %c0_i32_0 = arith.constant 0 : i32
    %c0_i32_1 = arith.constant 0 : i32
    return %c0_i32, %c0_i32_0 : i32, i32
  }
  func.func @transform_7(%arg0: i32, %arg1: i32) -> (i32, i32) {
    %c0_i32 = arith.constant 0 : i32
    %c0_i32_0 = arith.constant 0 : i32
    %c0_i32_1 = arith.constant 0 : i32
    return %c0_i32, %c0_i32_0 : i32, i32
  }
  func.func @transform_8(%arg0: i32, %arg1: i32) -> (i32, i32) {
    %c0_i32 = arith.constant 0 : i32
    %c0_i32_0 = arith.constant 0 : i32
    %c0_i32_1 = arith.constant 0 : i32
    return %c0_i32, %c0_i32_0 : i32, i32
  }
  func.func @transform_9(%arg0: i32, %arg1: i32) -> (i32, i32) {
    %c0_i32 = arith.constant 0 : i32
    %c0_i32_0 = arith.constant 0 : i32
    %c0_i32_1 = arith.constant 0 : i32
    return %c0_i32, %c0_i32_0 : i32, i32
  }
  func.func @transform_10(%arg0: i32, %arg1: i32) -> (i32, i32, i32, i32) {
    %c0_i32 = arith.constant 0 : i32
    %c0_i32_0 = arith.constant 0 : i32
    %c0_i32_1 = arith.constant 0 : i32
    return %arg0, %arg1, %c0_i32, %c0_i32_0 : i32, i32, i32, i32
  }
}

</mosaic_0001>

<bundles_post_ra>
// kernel: inverted_residual.1
= control target key start
LH: loop header
LB: loop body
LE: loop exit
PB: predicated region body
PF: predicated region fallthrough
CT: control target
= control target key end

     0   :  { %s2080_s13 = smov 0   ;;  %s2082_s14 = smov 0   ;;  %s3286_s0 = inlined_call_operand.vmem [shape: f32[2,18,16,4], index: 0, kind: input, shape index: {}]   ;;  %s3287_s1 = inlined_call_operand.vmem [shape: f32[4,128], index: 1, kind: input, shape index: {}]   ;;  %s3288_s2 = inlined_call_operand.vmem [shape: f32[1,128], index: 2, kind: input, shape index: {}]   ;;  %s3289_s3 = inlined_call_operand.vmem [shape: f32[1,128], index: 3, kind: input, shape index: {}]   ;;  %s3290_s4 = inlined_call_operand.vmem [shape: f32[3,3,128], index: 4, kind: input, shape index: {}]   ;;  %s3291_s5 = inlined_call_operand.vmem [shape: f32[1,128], index: 5, kind: input, shape index: {}]   ;;  %s3292_s6 = inlined_call_operand.vmem [shape: f32[1,128], index: 6, kind: input, shape index: {}]   ;;  %s3293_s7 = inlined_call_operand.vmem [shape: bf16[128,128], index: 7, kind: input, shape index: {}]   ;;  %s3294_s8 = inlined_call_operand.vmem [shape: f32[1,128], index: 8, kind: input, shape index: {}]   ;;  %s3295_s9 = inlined_call_operand.vmem [shape: f32[1,128], index: 9, kind: input, shape index: {}]   ;;  %s3296_s10 = inlined_call_operand.vmem [shape: f32[2,16,16,128], index: 10, kind: output, shape index: {}]  }
   0x1   :  { %s2084_s15 = smov 0   ;;  %s2086_s16 = smov 0  }
   0x2   :  { %s2088_s17 = smov 0  }
   0x3 LB: > { %s29_s18 = sadd.s32 1, %s2015_s15  ;;  %s32_s19 = sadd.s32 1, %s2019_s16  ;;  %s2023_s17 = sphi %s2088_s17, %s20_s17   ;;  %s2019_s16 = sphi %s2086_s16, %s3433_s16   ;;  %s2015_s15 = sphi %s2084_s15, %s3432_s15   ;;  %s2011_s14 = sphi %s2082_s14, %s3431_s14   ;;  %s2007_s13 = sphi %s2080_s13, %s3430_s13  }
   0x4   : > { %p30_p0 = scmp.ge.s32.totalorder %s29_s18, 2  ;;  %p1754_p1 = scmp.ge.s32.totalorder %s2023_s17, 1 }
   0x5   : > { %p326_p2 = scmp.lt.s32.totalorder %s2023_s17, 5 }
   0x6   : > { %s3435_s18 = smov (%p30_p0, %s29_s18), 0  ;;  %s3437_s19 = smov (!%p30_p0, %s32_s19), %s2019_s16 }
   0x7   : > { %p327_p3 = pnand %p1754_p1, %p326_p2  ;;  %p34_p4 = scmp.ge.s32.totalorder %s3437_s19, 2 }
   0x9   : > { %s3439_s19 = smov (%p34_p4, %s3437_s19), 0  ;;  %330 = sbr.rel (%p327_p3) target bundleno = 615 (0x267), region = 60 }
  0x10   : > { %v409_v0 = vld [vmem:[%s3287_s1] sm:$0xf]  ;;  %vm471_vm0 = vcmask 1043456   ;;  %p369_p5 = scmp.lt.s32.totalorder %s2011_s14, 1  ;;  %s1817_s23 = sshll.u32 %s2007_s13, 7  ;;  %vm410_vm1 = vcmask 31744   ;;  %v817_v29 = vlaneseq }
  0x11   : > { %1856 = vmatprep.subr.msk.mxu0 %vm471_vm0, %v409_v0  ;;  %v1977_v21 = vld [vmem:[%s3293_s7] sm:$0xff]   ;;  %v1978_v22 = vld [vmem:[%s3293_s7 + $0x8] sm:$0xff]   ;;  %v1979_v23 = vld [vmem:[%s3293_s7 + $0x10] sm:$0xff]   ;;  %s2191_s12 = sshll.u32 %s2007_s13, 3 }
  0x12   : > { %1857 = vmatpush3.msk.msra.mxu0 %vm471_vm0, %v409_v0  ;;  %s3441_s14 = smov (!%p369_p5, %s2011_s14), 1  ;;  %1920 = vmatprep.subr.bf16.mxu1 %v1977_v21  ;;  %v1980_v24 = vld [vmem:[%s3293_s7 + $0x18] sm:$0xff]   ;;  %v1981_v25 = vld [vmem:[%s3293_s7 + $0x20] sm:$0xff]   ;;  %v1982_v26 = vld [vmem:[%s3293_s7 + $0x28] sm:$0xff]   ;;  %v2188_v30 = vshrl.u32 %v817_v29, 7  ;;  %v2194_v31 = vstv %s2191_s12  ;;  %p377_p6 = scmp.lt.s32.totalorder %s2191_s12, 15 }
  0x13   : > { %s1936_s22 = smul.u32 288, %s3441_s14  ;;  %1888 = vmatprep.subr.bf16.mxu0 %v1977_v21  ;;  %1928 = vmatpush3.bf16.msra.mxu1 %v1977_v21  ;;  %v1983_v27 = vld [vmem:[%s3293_s7 + $0x30] sm:$0xff]   ;;  %v1984_v28 = vld [vmem:[%s3293_s7 + $0x38] sm:$0xff]   ;;  %v2200_v33 = vld [vmem:[%s3288_s2] ss:$0 sm:$0xff]  ;;  %v735_v36 = vadd.s32 1, %v2194_v31 }
  0x14   : > { %1921 = vmatprep.subr.bf16.mxu1 %v1978_v22  ;;  %v997_v32 = vsub.s32 1, %v2188_v30  ;;  %v814_v34 = vld [vmem:[%s3290_s4] sm:$0x7]  ;;  %v889_v35 = vsub.s32 0, %v2188_v30  ;;  %v1172_v37 = vsub.s32 2, %v2188_v30  ;;  %v2209_v38 = vadd.s32 8, %v2188_v30 }
  0x15   : > { %s373_s26 = scalar_lea.vmem %s3286_s0, %s1936_s22  ;;  %v2214_v40 = vld [vmem:[%s3289_s3] ss:$0 sm:$0xff]  ;;  %vm744_vm2 = vcmp.ge.s32.totalorder %v2194_v31, 1  ;;  %vm754_vm3 = vcmp.le.s32.totalorder %v2194_v31, 16  ;;  %v815_v44 = vld [vmem:[%s3290_s4 + $0x4] sm:$0x7] }
  0x16   : > { %s2122_s27 = scalar_lea.vmem %s373_s26, %s1817_s23  ;;  %v2219_v42 = vrot.slane %v814_v34, %v997_v32  ;;  %v2224_v45 = vrot.slane %v814_v34, %v889_v35  ;;  %vm842_vm4 = vcmp.lt.s32.totalorder %v2188_v30, 1  ;;  %vm745_vm5 = vcmp.ge.s32.totalorder %v735_v36, 1  ;;  %v816_v47 = vld [vmem:[%s3290_s4 + $0x8] sm:$0x7]  ;;  %vm2254_vm10 = vmand %vm744_vm2, %vm754_vm3  ;;  %s3443_s12 = smov (!%p377_p6, %s2191_s12), 15 }
  0x17   : > { %v389_v1 = vld [vmem:[%s2122_s27] sm:$0xff]  ;;  %v390_v2 = vld [vmem:[%s2122_s27 + $0x8] sm:$0xff]  ;;  %v391_v3 = vld [vmem:[%s2122_s27 + $0x10] sm:$0xff]  ;;  %1929 = vmatpush3.bf16.msra.mxu1 %v1978_v22  ;;  %vm755_vm6 = vcmp.le.s32.totalorder %v735_v36, 16  ;;  %v2232_v49 = vrot.slane %v814_v34, %v1172_v37  ;;  %vm820_vm7 = vcmp.ge.s32.totalorder %v2188_v30, 1  ;;  %vm1104_vm8 = vcmp.le.s32.totalorder %v2209_v38, 14 }
  0x18   : > { %1858 = vmatprep.mubr.msk.f32.mxu0 %vm410_vm1, %v389_v1  ;;  %v392_v4 = vld [vmem:[%s2122_s27 + $0x18] sm:$0xff]  ;;  %v393_v5 = vld [vmem:[%s2122_s27 + $0x20] sm:$0xff]  ;;  %v394_v6 = vld [vmem:[%s2122_s27 + $0x28] sm:$0xff]  ;;  %1922 = vmatprep.subr.bf16.mxu1 %v1979_v23  ;;  %vm1125_vm9 = vcmp.lt.s32.totalorder %v2188_v30, 7  ;;  %v2238_v52 = vrot.slane %v815_v44, %v889_v35  ;;  %v2240_v53 = vrot.slane %v815_v44, %v997_v32  ;;  %v2242_v54 = vrot.slane %v815_v44, %v1172_v37  ;;  %s1757_s22 = sshll.u32 %s3443_s12, 1  ;;  %s1758_s23 = sshll.u32 %s3441_s14, 5 }
  0x19   : > { %1859 = vmatmul.mubr.msk.f32.vlgmr.msra.gmra.mrb[0].mxu0 %vm410_vm1, %v390_v2  ;;  %v395_v7 = vld [vmem:[%s2122_s27 + $0x30] sm:$0xff]  ;;  %v396_v8 = vld [vmem:[%s2122_s27 + $0x38] sm:$0xff]  ;;  %v397_v9 = vld [vmem:[%s2122_s27 + $0x40] sm:$0xff]  ;;  %v2246_v58 = vadd.s32 2, %v2194_v31  ;;  %v2248_v59 = vrot.slane %v816_v47, %v997_v32  ;;  %v2259_v63 = vrot.slane %v816_v47, %v889_v35  ;;  %v2261_v0 = vrot.slane %v816_v47, %v1172_v37  ;;  %s381_s13 = sadd.s32 %s1758_s23, %s1757_s22 }
  0x1a   : > { %1861 = vmatprep.mubr.msk.f32.mxu0 %vm410_vm1, %v391_v3  ;;  %v398_v10 = vld [vmem:[%s2122_s27 + $0x48] sm:$0xff]  ;;  %v399_v11 = vld [vmem:[%s2122_s27 + $0x50] sm:$0xff]  ;;  %v400_v12 = vld [vmem:[%s2122_s27 + $0x58] sm:$0xff]  ;;  %1889 = vmatpush3.bf16.msra.mxu0 %v1977_v21  ;;  %3317 = vst [vmem:[#allocation2_spill] sm:$0xff] %v2242_v54  ;;  %v2265_v3 = vadd.s32 3, %v2194_v31  ;;  %s1759_s26 = sshll.u32 %s381_s13, 3 }
  0x1b   : > { %v401_v13 = vld [vmem:[%s2122_s27 + $0x60] sm:$0xff]  ;;  %v402_v14 = vld [vmem:[%s2122_s27 + $0x68] sm:$0xff]  ;;  %v403_v15 = vld [vmem:[%s2122_s27 + $0x70] sm:$0xff]  ;;  %1890 = vmatprep.subr.bf16.mxu0 %v1978_v22  ;;  %1930 = vmatpush3.bf16.msra.mxu1 %v1979_v23  ;;  %vm746_vm11 = vcmp.ge.s32.totalorder %v2246_v58, 1  ;;  %vm756_vm12 = vcmp.le.s32.totalorder %v2246_v58, 16  ;;  %s3174_s30 = scalar_lea.vmem %s3296_s10, %s1759_s26 }
  0x1c   : > { %v404_v16 = vld [vmem:[%s2122_s27 + $0x78] sm:$0xff]  ;;  %v405_v17 = vld [vmem:[%s2122_s27 + $0x80] sm:$0xff]  ;;  %v406_v18 = vld [vmem:[%s2122_s27 + $0x88] sm:$0xff]  ;;  %1923 = vmatprep.subr.bf16.mxu1 %v1980_v24  ;;  %vm747_vm14 = vcmp.ge.s32.totalorder %v2265_v3, 1  ;;  %vm757_vm15 = vcmp.le.s32.totalorder %v2265_v3, 16 }
  0x1d   : > { %1862 = vmatmul.mubr.msk.f32.gmra.mrb[2].mxu0 %vm410_vm1, %v392_v4  ;;  %v407_v19 = vld [vmem:[%s2122_s27 + $0x90] sm:$0xff]  ;;  %v408_v20 = vld [vmem:[%s2122_s27 + $0x98] sm:$0xff]  ;;  %v2268_v4 = vadd.s32 4, %v2194_v31  ;;  %vm2298_vm13 = vmand %vm745_vm5, %vm755_vm6 }
  0x1e   : > { %1864 = vmatprep.mubr.msk.f32.mxu0 %vm410_vm1, %v393_v5  ;;  %1891 = vmatpush3.bf16.msra.mxu0 %v1978_v22  ;;  %v2291_v22 = vadd.s32 9, %v2194_v31  ;;  %vm2364_vm0 = vmand %vm746_vm11, %vm756_vm12 }
  0x1f   : > { %1892 = vmatprep.subr.bf16.mxu0 %v1979_v23  ;;  %1931 = vmatpush3.bf16.msra.mxu1 %v1980_v24  ;;  %vm2400_vm2 = vmand %vm747_vm14, %vm757_vm15  ;;  %vm748_vm3 = vcmp.ge.s32.totalorder %v2268_v4, 1  ;;  %vm758_vm5 = vcmp.le.s32.totalorder %v2268_v4, 16 }
  0x20   : > { %1924 = vmatprep.subr.bf16.mxu1 %v1981_v25  ;;  %vm2487_vm6 = vmand %vm748_vm3, %vm758_vm5 }
  0x21   : > { %1865 = vmatmul.mubr.msk.f32.gmra.mrb[4].mxu0 %vm410_vm1, %v394_v6 }
  0x22   : > { %1867 = vmatprep.mubr.msk.f32.mxu0 %vm410_vm1, %v395_v7  ;;  %1893 = vmatpush3.bf16.msra.mxu0 %v1979_v23 }
  0x23   : > { %1894 = vmatprep.subr.bf16.mxu0 %v1980_v24  ;;  %1932 = vmatpush3.bf16.msra.mxu1 %v1981_v25 }
  0x24   : > { %1925 = vmatprep.subr.bf16.mxu1 %v1982_v26 }
  0x25   : > { %1868 = vmatmul.mubr.msk.f32.gmra.mrb[6].mxu0 %vm410_vm1, %v396_v8  ;;  %v2272_v8 = vadd.s32 5, %v2194_v31 }
  0x26   : > { %1870 = vmatprep.mubr.msk.f32.mxu0 %vm410_vm1, %v397_v9  ;;  %1895 = vmatpush3.bf16.msra.mxu0 %v1980_v24  ;;  %v2275_v9 = vadd.s32 6, %v2194_v31 }
  0x27   : > { %1896 = vmatprep.subr.bf16.mxu0 %v1981_v25  ;;  %1933 = vmatpush3.bf16.msra.mxu1 %v1982_v26  ;;  %vm759_vm11 = vcmp.le.s32.totalorder %v2272_v8, 16 }
  0x28   : > { %1926 = vmatprep.subr.bf16.mxu1 %v1983_v27  ;;  %vm750_vm12 = vcmp.ge.s32.totalorder %v2275_v9, 1 }
  0x29   : > { %1871 = vmatmul.mubr.msk.f32.gmra.mrb[8].mxu0 %vm410_vm1, %v398_v10 }
  0x2a   : > { %1873 = vmatprep.mubr.msk.f32.mxu0 %vm410_vm1, %v399_v11  ;;  %1897 = vmatpush3.bf16.msra.mxu0 %v1981_v25 }
  0x2b   : > { %1898 = vmatprep.subr.bf16.mxu0 %v1982_v26  ;;  %1934 = vmatpush3.bf16.msra.mxu1 %v1983_v27 }
  0x2c   : > { %1927 = vmatprep.subr.bf16.mxu1 %v1984_v28 }
  0x2d   : > { %1874 = vmatmul.mubr.msk.f32.gmra.mrb[10].mxu0 %vm410_vm1, %v400_v12 }
  0x2e   : > { %1876 = vmatprep.mubr.msk.f32.mxu0 %vm410_vm1, %v401_v13  ;;  %1899 = vmatpush3.bf16.msra.mxu0 %v1982_v26 }
  0x2f   : > { %1900 = vmatprep.subr.bf16.mxu0 %v1983_v27  ;;  %1935 = vmatpush3.bf16.msra.mxu1 %v1984_v28 }
  0x31   : > { %1877 = vmatmul.mubr.msk.f32.gmra.mrb[12].mxu0 %vm410_vm1, %v402_v14  ;;  %v2283_v14 = vadd.s32 7, %v2194_v31 }
  0x32   : > { %1879 = vmatprep.mubr.msk.f32.mxu0 %vm410_vm1, %v403_v15  ;;  %1901 = vmatpush3.bf16.msra.mxu0 %v1983_v27 }
  0x33   : > { %1902 = vmatprep.subr.bf16.mxu0 %v1984_v28 }
  0x35   : > { %1880 = vmatmul.mubr.msk.f32.gmra.mrb[14].mxu0 %vm410_vm1, %v404_v16 }
  0x36   : > { %1882 = vmatprep.mubr.msk.f32.mxu0 %vm410_vm1, %v405_v17  ;;  %1903 = vmatpush3.bf16.msra.mxu0 %v1984_v28 }
  0x39   : > { %1883 = vmatmul.mubr.msk.f32.gmra.mrb[16].mxu0 %vm410_vm1, %v406_v18  ;;  %v2288_v18 = vadd.s32 8, %v2194_v31 }
  0x3a   : > { %1885 = vmatprep.mubr.msk.f32.mxu0 %vm410_vm1, %v407_v19 }
  0x3b   : > { %vm752_vm3 = vcmp.ge.s32.totalorder %v2288_v18, 1  ;;  %vm762_vm5 = vcmp.le.s32.totalorder %v2288_v18, 16 }
  0x3d   : > { %1886 = vmatmul.mubr.msk.f32.gmra.mrb[18].mxu0 %vm410_vm1, %v408_v20 }
  0xec   : > { %v1860_v39 = vpop.f32.mrb[0].mxu0 }
  0xed   : > { %v648_v41 = vmul.f32 %v1860_v39, %v2200_v33  ;;  %v541_v43 = vpop.f32.mrb[1].mxu0 }
  0xee   : > { %v647_v46 = vmul.f32 %v2200_v33, %v541_v43 }
  0xef   : > { %v675_v48 = vadd.f32 %v2214_v40, %v648_v41 }
  0xf0   : > { %v674_v50 = vadd.f32 %v2214_v40, %v647_v46  ;;  %v1863_v51 = vpop.f32.mrb[2].mxu0 }
  0xf1   : > { %v695_v55 = vmax.f32 %v675_v48, 0.0  ;;  %v650_v56 = vmul.f32 %v1863_v51, %v2200_v33  ;;  %v551_v57 = vpop.f32.mrb[3].mxu0 }
  0xf2   : > { %v694_v61 = vmax.f32 %v674_v50, 0.0  ;;  %v649_v62 = vmul.f32 %v2200_v33, %v551_v57 }
  0xf3   : > { %v715_v1 = vmin.f32 %v695_v55, 6.0  ;;  %v677_v2 = vadd.f32 %v2214_v40, %v650_v56 }
  0xf4   : > { %v714_v5 = vmin.f32 %v694_v61, 6.0  ;;  %v676_v6 = vadd.f32 %v2214_v40, %v649_v62  ;;  %v1866_v7 = vpop.f32.mrb[4].mxu0 }
  0xf5   : > { %v795_v10 = vsel %vm2254_vm10, %v715_v1, 0.0  ;;  %v697_v11 = vmax.f32 %v677_v2, 0.0  ;;  %v652_v12 = vmul.f32 %v1866_v7, %v2200_v33  ;;  %v561_v13 = vpop.f32.mrb[5].mxu0 }
  0xf6   : > { %v832_v15 = vrot.slane %v795_v10, 7  ;;  %v1115_v16 = vrot.slane %v795_v10, 1  ;;  %v794_v17 = vsel %vm2254_vm10, %v714_v5, 0.0  ;;  %v2294_v23 = vmul.f32 %v2219_v42, %v795_v10 }
  0xf7   : > { %v822_v19 = vrot.slane %v794_v17, 7  ;;  %v1105_v20 = vrot.slane %v794_v17, 1  ;;  %v717_v21 = vmin.f32 %v697_v11, 6.0  ;;  %v696_v25 = vmax.f32 %v676_v6, 0.0 }
  0xf8   : > { %v679_v26 = vadd.f32 %v2214_v40, %v652_v12  ;;  %v651_v27 = vmul.f32 %v2200_v33, %v561_v13  ;;  %v1869_v28 = vpop.f32.mrb[6].mxu0  ;;  %v2318_v39 = vmul.f32 %v2219_v42, %v794_v17  ;;  %vm749_vm10 = vcmp.ge.s32.totalorder %v2272_v8, 1 }
  0xf9   : > { %v843_v29 = vsel %vm842_vm4, %v822_v19, %v832_v15  ;;  %v853_v31 = vsel %vm842_vm4, %v832_v15, %v822_v19  ;;  %v1126_v32 = vsel %vm1125_vm9, %v1105_v20, %v1115_v16  ;;  %v1136_v34 = vsel %vm1125_vm9, %v1115_v16, %v1105_v20  ;;  %v571_v35 = vpop.f32.mrb[7].mxu0  ;;  %vm769_vm14 = vmand %vm749_vm10, %vm759_vm11 }
  0xfa   : > { %v867_v36 = vsel %vm820_vm7, %v853_v31, 0.0  ;;  %v892_v37 = vmul.f32 %v2224_v45, %v843_v29  ;;  %v1151_v41 = vsel %vm1104_vm8, %v1136_v34, 0.0  ;;  %v2324_v44 = vmul.f32 %v2232_v49, %v1126_v32 }
  0xfb   : > { %v891_v43 = vmul.f32 %v2224_v45, %v867_v36  ;;  %v797_v46 = vsel %vm2298_vm13, %v717_v21, 0.0  ;;  %v716_v47 = vmin.f32 %v696_v25, 6.0  ;;  %v2329_v48 = vmul.f32 %v2232_v49, %v1151_v41 }
  0xfc   : > { %3322 = vst [vmem:[#allocation3_spill] sm:$0xff] %v2324_v44  ;;  %v833_v50 = vrot.slane %v797_v46, 7  ;;  %v2332_v51 = vmul.f32 %v2219_v42, %v797_v46  ;;  %v1116_v55 = vrot.slane %v797_v46, 1  ;;  %v1872_v56 = vpop.f32.mrb[8].mxu0  ;;  %v699_v60 = vmax.f32 %v679_v26, 0.0 }
  0xfd   : > { %3323 = vst [vmem:[#allocation4_spill] sm:$0xff] %v2329_v48  ;;  %v796_v57 = vsel %vm2298_vm13, %v716_v47, 0.0  ;;  %v678_v61 = vadd.f32 %v2214_v40, %v651_v27  ;;  %v654_v62 = vmul.f32 %v1869_v28, %v2200_v33  ;;  %v2338_v1 = vpop.f32.mrb[9].mxu0  ;;  %v2341_v2 = vmul.f32 %v2240_v53, %v797_v46 }
  0xfe   : > { %v823_v5 = vrot.slane %v796_v57, 7  ;;  %v2344_v6 = vmul.f32 %v2219_v42, %v796_v57  ;;  %v1106_v7 = vrot.slane %v796_v57, 1  ;;  %v2347_v10 = vmul.f32 %v2240_v53, %v796_v57 }
  0xff   : > { %v719_v11 = vmin.f32 %v699_v60, 6.0  ;;  %v698_v12 = vmax.f32 %v678_v61, 0.0  ;;  %v681_v13 = vadd.f32 %v2214_v40, %v654_v62  ;;  %v653_v27 = vmul.f32 %v2200_v33, %v571_v35 }
 0x100   : > { %v844_v15 = vsel %vm842_vm4, %v823_v5, %v833_v50  ;;  %v854_v16 = vsel %vm842_vm4, %v833_v50, %v823_v5  ;;  %v2356_v17 = vsel %vm1125_vm9, %v1106_v7, %v1116_v55  ;;  %v1137_v19 = vsel %vm1125_vm9, %v1116_v55, %v1106_v7  ;;  %v1875_v21 = vpop.f32.mrb[10].mxu0 }
 0x101   : > { %3324 = vst [vmem:[#allocation5_spill] sm:$0xff] %v2356_v17  ;;  %v869_v24 = vsel %vm820_vm7, %v854_v16, 0.0  ;;  %v928_v25 = vmul.f32 %v2238_v52, %v844_v15  ;;  %v2373_v26 = vsel %vm1104_vm8, %v1137_v19, 0.0  ;;  %v591_v28 = vpop.f32.mrb[11].mxu0  ;;  %v894_v58 = vmul.f32 %v2224_v45, %v844_v15 }
 0x102   : > { %3327 = vst [vmem:[#allocation6_spill] sm:$0xff] %v2373_v26  ;;  %v893_v29 = vmul.f32 %v2224_v45, %v869_v24  ;;  %v927_v31 = vmul.f32 %v2238_v52, %v869_v24  ;;  %v2381_v32 = vmul.f32 %v2232_v49, %v2356_v17  ;;  %v2385_v36 = vsel %vm2364_vm0, %v719_v11, 0.0 }
 0x103   : > { %v944_v34 = vadd.f32 %v928_v25, %v892_v37  ;;  %v718_v41 = vmin.f32 %v698_v12, 6.0  ;;  %v701_v46 = vmax.f32 %v681_v13, 0.0  ;;  %v2389_v35 = vmul.f32 %v2232_v49, %v2373_v26 }
 0x104   : > { %v943_v47 = vadd.f32 %v927_v31, %v891_v43  ;;  %v834_v50 = vrot.slane %v2385_v36, 7  ;;  %v2394_v55 = vmul.f32 %v2219_v42, %v2385_v36  ;;  %v1878_v43 = vpop.f32.mrb[12].mxu0  ;;  %v2408_v57 = vmul.f32 %v2240_v53, %v2385_v36 }
 0x105   : > { %3328 = vst [vmem:[#allocation7_spill] sm:$0xff] %v2389_v35  ;;  %v2412_v60 = vmul.f32 %v2248_v59, %v2385_v36  ;;  %v2416_v3 = vsel %vm2364_vm0, %v718_v41, 0.0  ;;  %v721_v61 = vmin.f32 %v701_v46, 6.0  ;;  %v601_v62 = vpop.f32.mrb[13].mxu0  ;;  %v680_v19 = vadd.f32 %v2214_v40, %v653_v27 }
 0x106   : > { %3329 = vst [vmem:[#allocation8_spill] sm:$0xff] %v2394_v55  ;;  %v824_v7 = vrot.slane %v2416_v3, 7  ;;  %v2422_v11 = vmul.f32 %v2219_v42, %v2416_v3  ;;  %v2426_v12 = vmul.f32 %v2240_v53, %v2416_v3  ;;  %v1071_v13 = vmul.f32 %v2248_v59, %v2416_v3 }
 0x107   : > { %3332 = vst [vmem:[#allocation9_spill] sm:$0xff] %v2412_v60  ;;  %v2433_v16 = vsel %vm2400_vm2, %v721_v61, 0.0  ;;  %v656_v31 = vmul.f32 %v1872_v56, %v2200_v33  ;;  %vm760_vm13 = vcmp.le.s32.totalorder %v2275_v9, 16  ;;  %vm751_vm0 = vcmp.ge.s32.totalorder %v2283_v14, 1 }
 0x108   : > { %3333 = vst [vmem:[#allocation10_spill] sm:$0xff] %v2422_v11  ;;  %v845_v20 = vsel %vm842_vm4, %v824_v7, %v834_v50  ;;  %v855_v24 = vsel %vm842_vm4, %v834_v50, %v824_v7  ;;  %v835_v25 = vrot.slane %v2433_v16, 7  ;;  %v2442_v41 = vpop.f32.mrb[14].mxu0  ;;  %v2450_v27 = vmul.f32 %v2219_v42, %v2433_v16  ;;  %vm2613_vm15 = vmand %vm750_vm12, %vm760_vm13 }
 0x109   : > { %v871_v46 = vsel %vm820_vm7, %v855_v24, 0.0  ;;  %v930_v61 = vmul.f32 %v2238_v52, %v845_v20  ;;  %v964_v15 = vmul.f32 %v2259_v63, %v845_v20  ;;  %v2452_v5 = vpop.f32.mrb[15].mxu0  ;;  %v896_v56 = vmul.f32 %v2224_v45, %v845_v20  ;;  %vm2773_vm12 = vmand %vm752_vm3, %vm762_vm5 }
 0x10a   : > { %3334 = vst [vmem:[#allocation11_spill] sm:$0xff] %v2450_v27  ;;  %v2455_v50 = vmul.f32 %v2224_v45, %v871_v46  ;;  %v929_v7 = vmul.f32 %v2238_v52, %v871_v46  ;;  %v963_v11 = vmul.f32 %v2259_v63, %v871_v46  ;;  %v2464_v26 = vmul.f32 %v2240_v53, %v2433_v16 }
 0x10b   : > { %v946_v24 = vadd.f32 %v930_v61, %v894_v58  ;;  %v2460_v55 = vadd.f32 %v964_v15, %v944_v34  ;;  %v2468_v27 = vmul.f32 %v2248_v59, %v2433_v16  ;;  %v683_v20 = vadd.f32 %v2214_v40, %v656_v31 }
 0x10c   : > { %3335 = vst [vmem:[#allocation12_spill] sm:$0xff] %v2455_v50  ;;  %3336 = vst [vmem:[#allocation13_spill] sm:$0xff] %v2464_v26  ;;  %v945_v48 = vadd.f32 %v929_v7, %v893_v29  ;;  %v979_v54 = vadd.f32 %v963_v11, %v943_v47  ;;  %v700_v50 = vmax.f32 %v680_v19, 0.0  ;;  %v2471_v17 = vpop.f32.mrb[16].mxu0  ;;  %v655_v58 = vmul.f32 %v2200_v33, %v2338_v1 }
 0x10d   : > { %v658_v34 = vmul.f32 %v1875_v21, %v2200_v33  ;;  %v657_v15 = vmul.f32 %v2200_v33, %v591_v28  ;;  %v660_v46 = vmul.f32 %v1878_v43, %v2200_v33  ;;  %v2478_v61 = vpop.f32.mrb[17].mxu0  ;;  %v703_v47 = vmax.f32 %v683_v20, 0.0 }
 0x10e   : > { %v1015_v26 = vadd.f32 %v2318_v39, %v979_v54  ;;  %v720_v29 = vmin.f32 %v700_v50, 6.0  ;;  %v659_v11 = vmul.f32 %v2200_v33, %v601_v62  ;;  %v1118_v19 = vrot.slane %v2433_v16, 1 }
 0x10f   : > { %v682_v21 = vadd.f32 %v2214_v40, %v655_v58  ;;  %v685_v28 = vadd.f32 %v2214_v40, %v658_v34  ;;  %v684_v54 = vadd.f32 %v2214_v40, %v657_v15  ;;  %v723_v62 = vmin.f32 %v703_v47, 6.0 }
 0x110   : > { %v1051_v39 = vadd.f32 %v2347_v10, %v1015_v26  ;;  %v800_v43 = vsel %vm2400_vm2, %v720_v29, 0.0  ;;  %v687_v16 = vadd.f32 %v2214_v40, %v660_v46  ;;  %v2498_v31 = vpop.f32.mrb[18].mxu0  ;;  %v2507_v20 = vadd.f32 %v2214_v40, %v659_v11 }
 0x111   : > { %v825_v4 = vrot.slane %v800_v43, 7  ;;  %v2501_v50 = vmul.f32 %v2219_v42, %v800_v43  ;;  %v2504_v7 = vmul.f32 %v2240_v53, %v800_v43  ;;  %v2509_v58 = vpop.f32.mrb[19].mxu0  ;;  %v1073_v26 = vmul.f32 %v2248_v59, %v800_v43 }
 0x112   : > { %v2511_v10 = vadd.f32 %v1071_v13, %v1051_v39  ;;  %v1108_v37 = vrot.slane %v800_v43, 1  ;;  %v2516_v34 = vsel %vm2487_vm6, %v723_v62, 0.0  ;;  %v702_v29 = vmax.f32 %v682_v21, 0.0 }
 0x113   : > { %3339 = vst [vmem:[#allocation14_spill] sm:$0xff] %v2504_v7  ;;  %3341 = vst [vmem:[#allocation16_spill] sm:$0xff] %v2516_v34  ;;  %v846_v15 = vsel %vm842_vm4, %v825_v4, %v835_v25  ;;  %v856_v46 = vsel %vm842_vm4, %v835_v25, %v825_v4  ;;  %v836_v13 = vrot.slane %v2516_v34, 7  ;;  %v2533_v43 = vmul.f32 %v2219_v42, %v2516_v34 }
 0x114   : > { %3340 = vst [vmem:[#allocation15_spill] sm:$0xff] %v2511_v10  ;;  %v873_v47 = vsel %vm820_vm7, %v856_v46, 0.0  ;;  %v932_v11 = vmul.f32 %v2238_v52, %v846_v15  ;;  %v966_v39 = vmul.f32 %v2259_v63, %v846_v15  ;;  %v898_v62 = vmul.f32 %v2224_v45, %v846_v15 }
 0x115   : > { %3342 = vst [vmem:[#allocation17_spill] sm:$0xff] %v2533_v43  ;;  %v897_v25 = vmul.f32 %v2224_v45, %v873_v47  ;;  %v965_v21 = vmul.f32 %v2259_v63, %v873_v47  ;;  %v2540_v4 = vsel %vm1125_vm9, %v1108_v37, %v1118_v19  ;;  %v2543_v46 = vmul.f32 %v2238_v52, %v873_v47 }
 0x116   : > { %3343 = vst [vmem:[#allocation18_spill] sm:$0xff] %v2540_v4  ;;  %v2545_v7 = vadd.f32 %v932_v11, %v896_v56  ;;  %v982_v35 = vadd.f32 %v966_v39, %v946_v24  ;;  %v1139_v60 = vsel %vm1125_vm9, %v1118_v19, %v1108_v37  ;;  %v2555_v15 = vmul.f32 %v2261_v0, %v2540_v4 }
 0x117   : > { %v981_v43 = vadd.f32 %v965_v21, %v945_v48  ;;  %v2551_v44 = vsel %vm1104_vm8, %v1139_v60, 0.0  ;;  %v2559_v10 = vmul.f32 %v2240_v53, %v2516_v34  ;;  %v2568_v48 = vmul.f32 %v2248_v59, %v2516_v34 }
 0x118   : > { %3344 = vst [vmem:[#allocation19_spill] sm:$0xff] %v2551_v44  ;;  %v1018_v56 = vadd.f32 %v2332_v51, %v982_v35  ;;  %v2564_v24 = vmul.f32 %v2261_v0, %v2551_v44  ;;  %v722_v60 = vmin.f32 %v702_v29, 6.0  ;;  %v705_v37 = vmax.f32 %v685_v28, 0.0 }
 0x119   : > { %3345 = vst [vmem:[#allocation20_spill] sm:$0xff] %v2559_v10  ;;  %3346 = vst [vmem:[#allocation21_spill] sm:$0xff] %v2568_v48  ;;  %v1017_v19 = vadd.f32 %v2344_v6, %v981_v43  ;;  %v704_v47 = vmax.f32 %v684_v54, 0.0  ;;  %v707_v11 = vmax.f32 %v687_v16, 0.0  ;;  %v706_v35 = vmax.f32 %v2507_v20, 0.0 }
 0x11a   : > { %v2572_v39 = vadd.f32 %v2408_v57, %v1018_v56  ;;  %v2577_v51 = vsel %vm2487_vm6, %v722_v60, 0.0  ;;  %v662_v57 = vmul.f32 %v2442_v41, %v2200_v33  ;;  %v725_v54 = vmin.f32 %v705_v37, 6.0 }
 0x11b   : > { %3347 = vst [vmem:[#allocation22_spill] sm:$0xff] %v2577_v51  ;;  %v1053_v10 = vadd.f32 %v2426_v12, %v1017_v19  ;;  %v826_v29 = vrot.slane %v2577_v51, 7  ;;  %v2584_v6 = vmul.f32 %v2219_v42, %v2577_v51  ;;  %v2590_v28 = vmul.f32 %v2240_v53, %v2577_v51 }
 0x11c   : > { %v2594_v1 = vmul.f32 %v2248_v59, %v2577_v51  ;;  %v724_v16 = vmin.f32 %v704_v47, 6.0  ;;  %v727_v41 = vmin.f32 %v707_v11, 6.0  ;;  %vm761_vm2 = vcmp.le.s32.totalorder %v2283_v14, 16 }
 0x11d   : > { %v1089_v12 = vadd.f32 %v1073_v26, %v1053_v10  ;;  %v847_v20 = vsel %vm842_vm4, %v826_v29, %v836_v13  ;;  %v857_v43 = vsel %vm842_vm4, %v836_v13, %v826_v29  ;;  %v661_v34 = vmul.f32 %v2200_v33, %v2452_v5  ;;  %vm2740_vm6 = vmand %vm751_vm0, %vm761_vm2 }
 0x11e   : > { %3348 = vst [vmem:[#allocation23_spill] sm:$0xff] %v2594_v1  ;;  %v875_v56 = vsel %vm820_vm7, %v857_v43, 0.0  ;;  %v900_v60 = vmul.f32 %v2224_v45, %v847_v20  ;;  %v934_v19 = vmul.f32 %v2238_v52, %v847_v20  ;;  %v2623_v47 = vmul.f32 %v2259_v63, %v847_v20 }
 0x11f   : > { %v2618_v8 = vadd.f32 %v2381_v32, %v1089_v12  ;;  %v899_v13 = vmul.f32 %v2224_v45, %v875_v56  ;;  %v933_v37 = vmul.f32 %v2238_v52, %v875_v56  ;;  %v2626_v29 = vmul.f32 %v2259_v63, %v875_v56 }
 0x120   : > { %v950_v11 = vadd.f32 %v934_v19, %v898_v62  ;;  %v2628_v43 = vsel %vm769_vm14, %v725_v54, 0.0  ;;  %v2630_v9 = vsel %vm769_vm14, %v724_v16, 0.0  ;;  %v2639_v12 = vsel %vm2613_vm15, %v727_v41, 0.0 }
 0x121   : > { %3351 = vst [vmem:[#allocation24_spill] sm:$0xff] %v2626_v29  ;;  %3352 = vst [vmem:[#allocation25_spill] sm:$0xff] %v2628_v43  ;;  %v949_v10 = vadd.f32 %v933_v37, %v897_v25  ;;  %v837_v21 = vrot.slane %v2628_v43, 7  ;;  %v2635_v32 = vmul.f32 %v2219_v42, %v2628_v43  ;;  %v2643_v62 = vmul.f32 %v2240_v53, %v2628_v43 }
 0x122   : > { %3353 = vst [vmem:[#allocation26_spill] sm:$0xff] %v2630_v9  ;;  %v2647_v54 = vmul.f32 %v2248_v59, %v2628_v43  ;;  %v827_v16 = vrot.slane %v2630_v9, 7  ;;  %v2653_v20 = vmul.f32 %v2219_v42, %v2630_v9  ;;  %v2657_v41 = vmul.f32 %v2240_v53, %v2630_v9 }
 0x123   : > { %3354 = vst [vmem:[#allocation27_spill] sm:$0xff] %v2635_v32  ;;  %3355 = vst [vmem:[#allocation28_spill] sm:$0xff] %v2643_v62  ;;  %v1077_v56 = vmul.f32 %v2248_v59, %v2630_v9  ;;  %v838_v32 = vrot.slane %v2639_v12, 7  ;;  %v2671_v62 = vmul.f32 %v2219_v42, %v2639_v12  ;;  %v2679_v43 = vmul.f32 %v2240_v53, %v2639_v12 }
 0x124   : > { %3356 = vst [vmem:[#allocation29_spill] sm:$0xff] %v2647_v54  ;;  %v848_v37 = vsel %vm842_vm4, %v827_v16, %v837_v21  ;;  %v858_v25 = vsel %vm842_vm4, %v837_v21, %v827_v16  ;;  %v726_v29 = vmin.f32 %v706_v35, 6.0  ;;  %v664_v35 = vmul.f32 %v2471_v17, %v2200_v33 }
 0x125   : > { %v877_v54 = vsel %vm820_vm7, %v858_v25, 0.0  ;;  %v936_v19 = vmul.f32 %v2238_v52, %v848_v37  ;;  %v970_v9 = vmul.f32 %v2259_v63, %v848_v37  ;;  %3357 = vst [vmem:[#allocation30_spill] sm:$0xff] %v2679_v43  ;;  %v902_v21 = vmul.f32 %v2224_v45, %v848_v37 }
 0x126   : > { %v901_v44 = vmul.f32 %v2224_v45, %v877_v54  ;;  %v935_v16 = vmul.f32 %v2238_v52, %v877_v54  ;;  %v969_v4 = vmul.f32 %v2259_v63, %v877_v54  ;;  %v2689_v25 = vmul.f32 %v2248_v59, %v2639_v12 }
 0x127   : > { %v952_v1 = vadd.f32 %v936_v19, %v900_v60  ;;  %v2685_v48 = vadd.f32 %v970_v9, %v950_v11  ;;  %v689_v37 = vadd.f32 %v2214_v40, %v662_v57  ;;  %v3312_v60 = vrot.slane %v2639_v12, 1 }
 0x128   : > { %3358 = vst [vmem:[#allocation31_spill] sm:$0xff] %v2689_v25  ;;  %v951_v43 = vadd.f32 %v935_v16, %v899_v13  ;;  %v985_v51 = vadd.f32 %v969_v4, %v949_v10  ;;  %v2699_v11 = vsel %vm2613_vm15, %v726_v29, 0.0  ;;  %v663_v9 = vmul.f32 %v2200_v33, %v2478_v61 }
 0x129   : > { %v828_v4 = vrot.slane %v2699_v11, 7  ;;  %v2709_v57 = vmul.f32 %v2219_v42, %v2699_v11  ;;  %v666_v5 = vmul.f32 %v2498_v31, %v2200_v33  ;;  %v2715_v10 = vmul.f32 %v2240_v53, %v2699_v11 }
 0x12a   : > { %v1021_v13 = vadd.f32 %v2501_v50, %v985_v51  ;;  %v3313_v17 = vrot.slane %v2699_v11, 1  ;;  %v709_v26 = vmax.f32 %v689_v37, 0.0  ;;  %v688_v61 = vadd.f32 %v2214_v40, %v661_v34 }
 0x12b   : > { %v849_v51 = vsel %vm842_vm4, %v828_v4, %v838_v32  ;;  %v859_v29 = vsel %vm842_vm4, %v838_v32, %v828_v4  ;;  %v691_v54 = vadd.f32 %v2214_v40, %v664_v35  ;;  %v1079_v34 = vmul.f32 %v2248_v59, %v2699_v11 }
 0x12c   : > { %v1057_v50 = vadd.f32 %v2590_v28, %v1021_v13  ;;  %v879_v31 = vsel %vm820_vm7, %v859_v29, 0.0  ;;  %v938_v19 = vmul.f32 %v2238_v52, %v849_v51  ;;  %v972_v16 = vmul.f32 %v2259_v63, %v849_v51 }
 0x12d   : > { %v904_v28 = vmul.f32 %v2224_v45, %v849_v51  ;;  %v937_v13 = vmul.f32 %v2238_v52, %v879_v31  ;;  %v971_v32 = vmul.f32 %v2259_v63, %v879_v31  ;;  %v711_v14 = vmax.f32 %v691_v54, 0.0 }
 0x12e   : > { %v2731_v37 = vadd.f32 %v1077_v56, %v1057_v50  ;;  %v954_v4 = vadd.f32 %v938_v19, %v902_v21  ;;  %v2744_v29 = vadd.f32 %v972_v16, %v952_v1  ;;  %v2752_v56 = vsel %vm1125_vm9, %v3313_v17, %v3312_v60 }
 0x12f   : > { %v729_v50 = vmin.f32 %v709_v26, 6.0  ;;  %v953_v51 = vadd.f32 %v937_v13, %v901_v44  ;;  %v987_v25 = vadd.f32 %v971_v32, %v951_v43  ;;  %vm753_vm10 = vcmp.ge.s32.totalorder %v2291_v22, 1 }
 0x130   : > { %3359 = vst [vmem:[#allocation32_spill] sm:$0xff] %v2731_v37  ;;  %v708_v37 = vmax.f32 %v688_v61, 0.0  ;;  %vm763_vm11 = vcmp.le.s32.totalorder %v2291_v22, 16  ;;  %v903_v1 = vmul.f32 %v2224_v45, %v879_v31  ;;  %v690_v19 = vadd.f32 %v2214_v40, %v663_v9 }
 0x131   : > { %v2759_v21 = vsel %vm2740_vm6, %v729_v50, 0.0  ;;  %v693_v16 = vadd.f32 %v2214_v40, %v666_v5  ;;  %v1023_v26 = vadd.f32 %v2584_v6, %v987_v25  ;;  %v2779_v9 = vmul.f32 %v2232_v49, %v2752_v56  ;;  %vm2848_vm13 = vmand %vm753_vm10, %vm763_vm11 }
 0x132   : > { %v839_v44 = vrot.slane %v2759_v21, 7  ;;  %v2767_v43 = vmul.f32 %v2219_v42, %v2759_v21  ;;  %v2783_v6 = vmul.f32 %v2240_v53, %v2759_v21  ;;  %v2787_v25 = vmul.f32 %v2248_v59, %v2759_v21 }
 0x133   : > { %v728_v5 = vmin.f32 %v708_v37, 6.0  ;;  %v731_v54 = vmin.f32 %v711_v14, 6.0  ;;  %v1059_v18 = vadd.f32 %v2657_v41, %v1023_v26  ;;  %v710_v13 = vmax.f32 %v690_v19, 0.0 }
 0x134   : > { %3364 = vst [vmem:[#allocation33_spill] sm:$0xff] %v2783_v6  ;;  %v713_v32 = vmax.f32 %v693_v16, 0.0  ;;  %v1016_v17 = vadd.f32 %v2294_v23, %v2460_v55  ;;  %v2803_v37 = vadd.f32 %v2468_v27, %v2572_v39  ;;  %v665_v19 = vmul.f32 %v2200_v33, %v2509_v58 }
 0x135   : > { %v2793_v50 = vsel %vm2740_vm6, %v728_v5, 0.0  ;;  %v2797_v60 = vsel %vm2773_vm12, %v731_v54, 0.0  ;;  %v2805_v41 = vadd.f32 %v1079_v34, %v1059_v18  ;;  %v730_v55 = vmin.f32 %v710_v13, 6.0 }
 0x136   : > { %3365 = vst [vmem:[#allocation34_spill] sm:$0xff] %v2797_v60  ;;  %v829_v14 = vrot.slane %v2793_v50, 7  ;;  %v2810_v35 = vmul.f32 %v2219_v42, %v2793_v50  ;;  %v2816_v16 = vmul.f32 %v2240_v53, %v2793_v50  ;;  %v1081_v23 = vmul.f32 %v2248_v59, %v2793_v50 }
 0x137   : > { %v840_v27 = vrot.slane %v2797_v60, 7  ;;  %v2828_v33 = vmul.f32 %v2240_v53, %v2797_v60  ;;  %v2832_v58 = vmul.f32 %v2248_v59, %v2797_v60  ;;  %v692_v54 = vadd.f32 %v2214_v40, %v665_v19 }
 0x138   : > { %v850_v39 = vsel %vm842_vm4, %v829_v14, %v839_v44  ;;  %v860_v42 = vsel %vm842_vm4, %v839_v44, %v829_v14  ;;  %v2855_v6 = vsel %vm2773_vm12, %v730_v55, 0.0 }
 0x139   : > { %3366 = vst [vmem:[#allocation35_spill] sm:$0xff] %v2828_v33  ;;  %3367 = vst [vmem:[#allocation36_spill] sm:$0xff] %v2832_v58  ;;  %v881_v34 = vsel %vm820_vm7, %v860_v42, 0.0  ;;  %v940_v26 = vmul.f32 %v2238_v52, %v850_v39  ;;  %v974_v5 = vmul.f32 %v2259_v63, %v850_v39  ;;  %v906_v18 = vmul.f32 %v2224_v45, %v850_v39 }
 0x13a   : > { %v939_v44 = vmul.f32 %v2238_v52, %v881_v34  ;;  %v973_v14 = vmul.f32 %v2259_v63, %v881_v34  ;;  %v733_v58 = vmin.f32 %v713_v32, 6.0  ;;  %3370 = vst [vmem:[#allocation37_spill] sm:$0xff] %v2855_v6  ;;  %v905_v22 = vmul.f32 %v2224_v45, %v881_v34 }
 0x13b   : > { %v2842_v31 = vadd.f32 %v974_v5, %v954_v4  ;;  %v956_v33 = vadd.f32 %v940_v26, %v904_v28  ;;  %v3371_v4 = vrot.slane %v2759_v21, 1  ;;  %v3372_v28 = vrot.slane %v2793_v50, 1 }
 0x13c   : > { %v989_v39 = vadd.f32 %v973_v14, %v953_v51  ;;  %v955_v13 = vadd.f32 %v939_v44, %v903_v1  ;;  %v830_v26 = vrot.slane %v2855_v6, 7  ;;  %v2869_v40 = vmul.f32 %v2240_v53, %v2855_v6 }
 0x13d   : > { %v2863_v32 = vsel %vm1125_vm9, %v3372_v28, %v3371_v4  ;;  %v3314_v51 = vrot.slane %v2855_v6, 1  ;;  %v1083_v61 = vmul.f32 %v2248_v59, %v2855_v6  ;;  %v813_v19 = vsel %vm2848_vm13, %v733_v58, 0.0 }
 0x13e   : > { %v1025_v1 = vadd.f32 %v2653_v20, %v989_v39  ;;  %v712_v55 = vmax.f32 %v692_v54, 0.0  ;;  %v851_v45 = vsel %vm842_vm4, %v830_v26, %v840_v27  ;;  %v861_v34 = vsel %vm842_vm4, %v840_v27, %v830_v26 }
 0x13f   : > { %v3373_v53 = vrot.slane %v2797_v60, 1  ;;  %v2891_v5 = vmul.f32 %v2232_v49, %v2863_v32  ;;  %v883_v54 = vsel %vm820_vm7, %v861_v34, 0.0  ;;  %v942_v44 = vmul.f32 %v2238_v52, %v851_v45 }
 0x140   : > { %v1061_v58 = vadd.f32 %v2715_v10, %v1025_v1  ;;  %v976_v27 = vmul.f32 %v2259_v63, %v851_v45  ;;  %v941_v14 = vmul.f32 %v2238_v52, %v883_v54  ;;  %v975_v39 = vmul.f32 %v2259_v63, %v883_v54  ;;  %v3383_v54 = vld [vmem:[#allocation5_spill] sm:$0xff] }
 0x141   : > { %v2887_v20 = vsel %vm1125_vm9, %v3373_v53, %v3314_v51  ;;  %v841_v4 = vrot.slane %v813_v19, 7  ;;  %v1124_v28 = vrot.slane %v813_v19, 1  ;;  %v958_v53 = vadd.f32 %v942_v44, %v906_v18  ;;  %v3384_v44 = vld [vmem:[#allocation2_spill] sm:$0xff] }
 0x142   : > { %3374 = vst [vmem:[#allocation38_spill] sm:$0xff] %v2887_v20  ;;  %v2900_v26 = vadd.f32 %v1081_v23, %v1061_v58  ;;  %v992_v51 = vadd.f32 %v976_v27, %v956_v33  ;;  %v732_v20 = vmin.f32 %v712_v55, 6.0  ;;  %v991_v6 = vadd.f32 %v975_v39, %v955_v13  ;;  %v3380_v13 = vld [vmem:[#allocation3_spill] sm:$0xff]  ;;  %v3381_v58 = vld [vmem:[#allocation9_spill] sm:$0xff] }
 0x143   : > { %v957_v10 = vadd.f32 %v941_v14, %v905_v22  ;;  %v1052_v1 = vadd.f32 %v2341_v2, %v1016_v17  ;;  %v3375_v34 = vrot.slane %v2385_v36, 1  ;;  %v3376_v60 = vrot.slane %v2416_v3, 1  ;;  %v3379_v17 = vld [vmem:[#allocation15_spill] sm:$0xff] }
 0x144   : > { %v2912_v45 = vadd.f32 %v2671_v62, %v992_v51  ;;  %v812_v23 = vsel %vm2848_vm13, %v732_v20, 0.0  ;;  %v1190_v22 = vadd.f32 %v3380_v13, %v3379_v17  ;;  %v1027_v55 = vadd.f32 %v2709_v57, %v991_v6  ;;  %v3382_v36 = vld [vmem:[#allocation7_spill] sm:$0xff] }
 0x145   : > { %v2909_v52 = vsel %vm1125_vm9, %v3376_v60, %v3375_v34  ;;  %v3377_v33 = vmov %v3376_v60  ;;  %v3378_v18 = vmov %v3375_v34  ;;  %v2926_v60 = vmul.f32 %v2248_v59, %v813_v19 }
 0x146   : > { %v1138_v2 = vsel %vm1125_vm9, %v3378_v18, %v3377_v33  ;;  %v831_v62 = vrot.slane %v812_v23, 7  ;;  %v1114_v51 = vrot.slane %v812_v23, 1  ;;  %v1088_v42 = vadd.f32 %v3381_v58, %v1052_v1 }
 0x147   : > { %v2931_v3 = vsel %vm1104_vm8, %v1138_v2, 0.0  ;;  %v1193_v20 = vadd.f32 %v3382_v36, %v2803_v37  ;;  %v1210_v27 = vmul.f32 %v3384_v44, %v3383_v54  ;;  %v1063_v14 = vadd.f32 %v2816_v16, %v1027_v55  ;;  %v3385_v16 = vld [vmem:[#allocation4_spill] sm:$0xff]  ;;  %v3386_v2 = vld [vmem:[#allocation6_spill] sm:$0xff] }
 0x148   : > { %v852_v57 = vsel %vm842_vm4, %v831_v62, %v841_v4  ;;  %v862_v6 = vsel %vm842_vm4, %v841_v4, %v831_v62  ;;  %v2944_v19 = vsel %vm1125_vm9, %v1114_v51, %v1124_v28  ;;  %v2951_v1 = vsel %vm1125_vm9, %v1124_v28, %v1114_v51  ;;  %v3387_v36 = vld [vmem:[#allocation12_spill] sm:$0xff] }
 0x149   : > { %v885_v39 = vsel %vm820_vm7, %v862_v6, 0.0  ;;  %v978_v37 = vmul.f32 %v2259_v63, %v852_v57  ;;  %v1191_v34 = vadd.f32 %v3385_v16, %v1088_v42  ;;  %v1099_v33 = vadd.f32 %v1083_v61, %v1063_v14  ;;  %v3388_v57 = vld [vmem:[#allocation16_spill] sm:$0xff] }
 0x14a   : > { %v977_v18 = vmul.f32 %v2259_v63, %v885_v39  ;;  %v1085_v4 = vmul.f32 %v2248_v59, %v812_v23  ;;  %v1211_v17 = vmul.f32 %v3384_v44, %v3386_v2  ;;  %v1212_v55 = vmul.f32 %v3384_v44, %v2909_v52 }
 0x14b   : > { %v994_v13 = vadd.f32 %v978_v37, %v958_v53  ;;  %v1213_v62 = vmul.f32 %v3384_v44, %v2931_v3  ;;  %v1226_v58 = vadd.f32 %v1210_v27, %v1190_v22  ;;  %v2963_v28 = vadd.f32 %v2779_v9, %v1099_v33  ;;  %v2976_v22 = vld [vmem:[%s3291_s5] ss:$0 sm:$0xff] }
 0x14c   : > { %v993_v51 = vadd.f32 %v977_v18, %v957_v10  ;;  %v1227_v61 = vadd.f32 %v1211_v17, %v1191_v34  ;;  %v1246_v63 = vmul.f32 %v2261_v0, %v2909_v52  ;;  %v1228_v53 = vadd.f32 %v1212_v55, %v2618_v8  ;;  %v2986_v8 = vld [vmem:[%s3292_s6] ss:$0 sm:$0xff]  ;;  %v3393_v34 = vld [vmem:[#allocation8_spill] sm:$0xff] }
 0x14d   : > { %v2968_v59 = vadd.f32 %v2767_v43, %v994_v13  ;;  %v1229_v23 = vadd.f32 %v1213_v62, %v1193_v20  ;;  %v1247_v42 = vmul.f32 %v2261_v0, %v2931_v3  ;;  %v947_v54 = vadd.f32 %v2543_v46, %v3387_v36  ;;  %v3396_v62 = vld [vmem:[#allocation10_spill] sm:$0xff] }
 0x14e   : > { %v1029_v9 = vadd.f32 %v2810_v35, %v993_v51  ;;  %v1262_v10 = vadd.f32 %v1246_v63, %v1226_v58  ;;  %v984_v43 = vadd.f32 %v2623_v47, %v2545_v7  ;;  %v1264_v20 = vadd.f32 %v2555_v15, %v1228_v53  ;;  %v3390_v35 = vld [vmem:[#allocation22_spill] sm:$0xff]  ;;  %v3392_v47 = vld [vmem:[#allocation24_spill] sm:$0xff]  ;;  %v3397_v51 = vld [vmem:[#allocation13_spill] sm:$0xff] }
 0x14f   : > { %v1263_v27 = vadd.f32 %v1247_v42, %v1227_v61  ;;  %v1265_v14 = vadd.f32 %v2564_v24, %v1229_v23  ;;  %v3389_v6 = vrot.slane %v3388_v57, 1  ;;  %v3391_v39 = vrot.slane %v3390_v35, 1  ;;  %v3400_v35 = vld [vmem:[#allocation23_spill] sm:$0xff] }
 0x150   : > { %v1065_v37 = vadd.f32 %v2869_v40, %v1029_v9  ;;  %v1285_v7 = vmul.f32 %v2976_v22, %v1262_v10  ;;  %v983_v16 = vadd.f32 %v3392_v47, %v947_v54  ;;  %v1020_v33 = vadd.f32 %v3393_v34, %v984_v43  ;;  %v3399_v54 = vld [vmem:[#allocation21_spill] sm:$0xff] }
 0x151   : > { %v1130_v46 = vsel %vm1125_vm9, %v3391_v39, %v3389_v6  ;;  %v1286_v18 = vmul.f32 %v2976_v22, %v1263_v27  ;;  %v1287_v15 = vmul.f32 %v2976_v22, %v1264_v20  ;;  %v1288_v24 = vmul.f32 %v2976_v22, %v1265_v14 }
 0x152   : > { %v3394_v2 = vmov %v3391_v39  ;;  %v3395_v17 = vmov %v3389_v6  ;;  %v1101_v40 = vadd.f32 %v1085_v4, %v1065_v37  ;;  %v1308_v55 = vadd.f32 %v2986_v8, %v1285_v7  ;;  %v3398_v4 = vld [vmem:[#allocation14_spill] sm:$0xff] }
 0x153   : > { %v1140_v13 = vsel %vm1125_vm9, %v3395_v17, %v3394_v2  ;;  %v1019_v58 = vadd.f32 %v3396_v62, %v983_v16  ;;  %v1056_v61 = vadd.f32 %v3397_v51, %v1020_v33  ;;  %v1309_v63 = vadd.f32 %v2986_v8, %v1286_v18  ;;  %v3402_v2 = vld [vmem:[#allocation19_spill] sm:$0xff] }
 0x154   : > { %v1310_v53 = vadd.f32 %v2986_v8, %v1287_v15  ;;  %v1311_v23 = vadd.f32 %v2986_v8, %v1288_v24  ;;  %v1159_v42 = vsel %vm1104_vm8, %v1140_v13, 0.0  ;;  %v3018_v9 = vadd.f32 %v2891_v5, %v1101_v40  ;;  %v3401_v15 = vld [vmem:[#allocation18_spill] sm:$0xff] }
 0x155   : > { %v1324_v10 = vmax.f32 %v1308_v55, 0.0  ;;  %v1055_v36 = vadd.f32 %v3398_v4, %v1019_v58  ;;  %v1092_v43 = vadd.f32 %v3399_v54, %v1056_v61  ;;  %v1325_v27 = vmax.f32 %v1309_v63, 0.0  ;;  %v3403_v61 = vld [vmem:[#allocation11_spill] sm:$0xff] }
 0x156   : > { %v1326_v20 = vmax.f32 %v1310_v53, 0.0  ;;  %v1327_v14 = vmax.f32 %v1311_v23, 0.0  ;;  %v1178_v57 = vmul.f32 %v2232_v49, %v2909_v52  ;;  %v1179_v37 = vmul.f32 %v2232_v49, %v2931_v3  ;;  %v3404_v53 = vld [vmem:[#allocation25_spill] sm:$0xff] }
 0x157   : > { %v1340_v6 = vmin.f32 %v1324_v10, 6.0  ;;  %v1091_v39 = vadd.f32 %v3400_v35, %v1055_v36  ;;  %v1182_v5 = vmul.f32 %v2232_v49, %v1130_v46  ;;  %v1341_v7 = vmin.f32 %v1325_v27, 6.0  ;;  %v3406_v10 = vld [vmem:[#allocation26_spill] sm:$0xff]  ;;  %v3411_v35 = vld [vmem:[#allocation32_spill] sm:$0xff] }
 0x158   : > { %v1342_v47 = vmin.f32 %v1326_v20, 6.0  ;;  %v1343_v16 = vmin.f32 %v1327_v14, 6.0  ;;  %v1183_v34 = vmul.f32 %v2232_v49, %v1159_v42  ;;  %v1195_v18 = vadd.f32 %v1179_v37, %v1092_v43 }
 0x159   : > { %v1194_v33 = vadd.f32 %v1178_v57, %v1091_v39  ;;  %v1214_v24 = vmul.f32 %v3384_v44, %v3401_v15  ;;  %v1215_v52 = vmul.f32 %v3384_v44, %v3402_v2  ;;  %v1356_v17 = vpack.c.bf16 %v1341_v7, %v1340_v6  ;;  %v3410_v57 = vld [vmem:[#allocation20_spill] sm:$0xff] }
 0x15a   : > { %v1357_v13 = vpack.c.bf16 %v1343_v16, %v1342_v47  ;;  %v1216_v40 = vmul.f32 %v3384_v44, %v1130_v46  ;;  %v1217_v3 = vmul.f32 %v3384_v44, %v1159_v42  ;;  %v1250_v58 = vmul.f32 %v2261_v0, %v1130_v46 }
 0x15b   : > { %v1230_v55 = vadd.f32 %v1214_v24, %v1194_v33  ;;  %v1231_v62 = vadd.f32 %v1215_v52, %v1195_v18  ;;  %v1251_v51 = vmul.f32 %v2261_v0, %v1159_v42  ;;  %1904 = vmatprep.mubr.bf16.mxu0 %v1356_v17  ;;  %v1022_v63 = vadd.f32 %v3403_v61, %v2685_v48  ;;  %v3412_v33 = vld [vmem:[#allocation17_spill] sm:$0xff] }
 0x15c   : > { %v3405_v23 = vrot.slane %v3404_v53, 1  ;;  %v3407_v4 = vrot.slane %v3406_v10, 1  ;;  %v1180_v42 = vmul.f32 %v2232_v49, %v3401_v15  ;;  %1905 = vmatmul.mubr.bf16.vlgmr.msra.gmra.mrb[20].mxu0 %v1357_v13  ;;  %v1181_v14 = vmul.f32 %v2232_v49, %v3402_v2  ;;  %v3415_v52 = vld [vmem:[#allocation29_spill] sm:$0xff] }
 0x15d   : > { %v1266_v27 = vadd.f32 %v1250_v58, %v1230_v55  ;;  %v1267_v48 = vadd.f32 %v1251_v51, %v1231_v62  ;;  %v1058_v6 = vadd.f32 %v3410_v57, %v1022_v63  ;;  %v1024_v18 = vadd.f32 %v3412_v33, %v2744_v29  ;;  %v3416_v29 = vld [vmem:[#allocation28_spill] sm:$0xff] }
 0x15e   : > { %v1131_v36 = vsel %vm1125_vm9, %v3407_v4, %v3405_v23  ;;  %v3408_v54 = vmov %v3407_v4  ;;  %v3409_v43 = vmov %v3405_v23  ;;  %v1196_v39 = vadd.f32 %v1180_v42, %v3411_v35  ;;  %v3417_v4 = vld [vmem:[#allocation31_spill] sm:$0xff] }
 0x15f   : > { %v1141_v46 = vsel %vm1125_vm9, %v3409_v43, %v3408_v54  ;;  %v1252_v37 = vmul.f32 %v2261_v0, %v1131_v36  ;;  %v1289_v47 = vmul.f32 %v2976_v22, %v1266_v27  ;;  %v1290_v16 = vmul.f32 %v2976_v22, %v1267_v48  ;;  %v3418_v42 = vld [vmem:[#allocation27_spill] sm:$0xff] }
 0x160   : > { %v1161_v20 = vsel %vm1104_vm8, %v1141_v46, 0.0  ;;  %v3413_v15 = vrot.slane %v2699_v11, 1  ;;  %v3414_v24 = vrot.slane %v2639_v12, 1  ;;  %v1094_v17 = vadd.f32 %v3415_v52, %v1058_v6 }
 0x161   : > { %v1253_v7 = vmul.f32 %v2261_v0, %v1161_v20  ;;  %v1232_v13 = vadd.f32 %v1216_v40, %v1196_v39  ;;  %v1198_v62 = vadd.f32 %v1182_v5, %v2805_v41  ;;  %v1312_v58 = vadd.f32 %v2986_v8, %v1289_v47 }
 0x162   : > { %v1142_v2 = vsel %vm1125_vm9, %v3414_v24, %v3413_v15  ;;  %v1313_v51 = vadd.f32 %v2986_v8, %v1290_v16  ;;  %v1060_v61 = vadd.f32 %v3416_v29, %v1024_v18  ;;  %v1218_v11 = vmul.f32 %v3384_v44, %v1131_v36 }
 0x163   : > { %v1163_v55 = vsel %vm1104_vm8, %v1142_v2, 0.0  ;;  %v1197_v12 = vadd.f32 %v1181_v14, %v1094_v17  ;;  %v1268_v63 = vadd.f32 %v1252_v37, %v1232_v13  ;;  %v1219_v53 = vmul.f32 %v3384_v44, %v1161_v20  ;;  %v3419_v37 = vld [vmem:[#allocation30_spill] sm:$0xff] }
 0x164   : > { %v1254_v40 = vmul.f32 %v2261_v0, %v2752_v56  ;;  %v1328_v23 = vmax.f32 %v1312_v58, 0.0  ;;  %v1329_v10 = vmax.f32 %v1313_v51, 0.0  ;;  %v1096_v54 = vadd.f32 %v3417_v4, %v1060_v61 }
 0x165   : > { %v1234_v41 = vadd.f32 %v1218_v11, %v1198_v62  ;;  %v1233_v5 = vadd.f32 %v1217_v3, %v1197_v12  ;;  %v1291_v43 = vmul.f32 %v2976_v22, %v1268_v63  ;;  %v1255_v46 = vmul.f32 %v2261_v0, %v1163_v55 }
 0x166   : > { %v1026_v27 = vadd.f32 %v3418_v42, %v2842_v31  ;;  %v1344_v48 = vmin.f32 %v1328_v23, 6.0  ;;  %v1345_v14 = vmin.f32 %v1329_v10, 6.0  ;;  %v1199_v57 = vadd.f32 %v1183_v34, %v1096_v54  ;;  %v3423_v10 = vld [vmem:[#allocation34_spill] sm:$0xff]  ;;  %v3425_v54 = vld [vmem:[#allocation37_spill] sm:$0xff]  ;;  %v3427_v42 = vld [vmem:[#allocation36_spill] sm:$0xff] }
 0x167   : > { %v1270_v6 = vadd.f32 %v1254_v40, %v1234_v41  ;;  %v1269_v35 = vadd.f32 %v1253_v7, %v1233_v5  ;;  %v1314_v39 = vadd.f32 %v2986_v8, %v1291_v43  ;;  %v3420_v16 = vrot.slane %v2793_v50, 1 }
 0x168   : > { %v1062_v47 = vadd.f32 %v3419_v37, %v1026_v27  ;;  %v3421_v3 = vrot.slane %v2759_v21, 1  ;;  %v1358_v18 = vpack.c.bf16 %v1345_v14, %v1344_v48  ;;  %v1235_v15 = vadd.f32 %v1219_v53, %v1199_v57  ;;  %v3428_v48 = vld [vmem:[#allocation38_spill] sm:$0xff] }
 0x169   : > { %v1293_v31 = vmul.f32 %v2976_v22, %v1270_v6  ;;  %v1292_v7 = vmul.f32 %v2976_v22, %v1269_v35  ;;  %v1330_v24 = vmax.f32 %v1314_v39, 0.0  ;;  %v1184_v52 = vmul.f32 %v2232_v49, %v1131_v36 }
 0x16a   : > { %v1143_v33 = vsel %vm1125_vm9, %v3421_v3, %v3420_v16  ;;  %v1098_v2 = vadd.f32 %v2787_v25, %v1062_v47  ;;  %1908 = vmatprep.mubr.bf16.mxu1 %v1358_v18  ;;  %v1271_v50 = vadd.f32 %v1255_v46, %v1235_v15  ;;  %v1185_v17 = vmul.f32 %v2232_v49, %v1161_v20 }
 0x16b   : > { %v1165_v34 = vsel %vm1104_vm8, %v1143_v33, 0.0  ;;  %v1316_v21 = vadd.f32 %v2986_v8, %v1293_v31  ;;  %v1220_v13 = vmul.f32 %v3384_v44, %v2752_v56  ;;  %v1315_v62 = vadd.f32 %v2986_v8, %v1292_v7  ;;  %v3422_v56 = vld [vmem:[#allocation33_spill] sm:$0xff]  ;;  %v3429_v31 = vld [vmem:[#allocation35_spill] sm:$0xff] }
 0x16c   : > { %v1346_v58 = vmin.f32 %v1330_v24, 6.0  ;;  %v1200_v51 = vadd.f32 %v1184_v52, %v2900_v26  ;;  %v1221_v29 = vmul.f32 %v3384_v44, %v1163_v55  ;;  %v1294_v25 = vmul.f32 %v2976_v22, %v1271_v50 }
 0x16d   : > { %v1332_v61 = vmax.f32 %v1316_v21, 0.0  ;;  %v1201_v36 = vadd.f32 %v1185_v17, %v1098_v2  ;;  %v1256_v11 = vmul.f32 %v2261_v0, %v2863_v32  ;;  %v1331_v12 = vmax.f32 %v1315_v62, 0.0 }
 0x16e   : > { %v1236_v63 = vadd.f32 %v1220_v13, %v1200_v51  ;;  %v1257_v20 = vmul.f32 %v2261_v0, %v1165_v34  ;;  %v1064_v53 = vadd.f32 %v3422_v56, %v2912_v45  ;;  %v1317_v40 = vadd.f32 %v2986_v8, %v1294_v25 }
 0x16f   : > { %v1348_v23 = vmin.f32 %v1332_v61, 6.0  ;;  %v1237_v26 = vadd.f32 %v1221_v29, %v1201_v36  ;;  %v3424_v4 = vrot.slane %v3423_v10, 1  ;;  %v3426_v41 = vrot.slane %v3425_v54, 1 }
 0x170   : > { %v1347_v43 = vmin.f32 %v1331_v12, 6.0  ;;  %v1272_v46 = vadd.f32 %v1256_v11, %v1236_v63  ;;  %v1100_v27 = vadd.f32 %v3427_v42, %v1064_v53  ;;  %v1167_v14 = vsel %vm1104_vm8, %v3428_v48, 0.0 }
 0x171   : > { %v1134_v5 = vsel %vm1125_vm9, %v3426_v41, %v3424_v4  ;;  %v1333_v45 = vmax.f32 %v1317_v40, 0.0  ;;  %v1273_v57 = vadd.f32 %v1257_v20, %v1237_v26  ;;  %v1187_v6 = vmul.f32 %v2232_v49, %v1163_v55 }
 0x172   : > { %v1222_v35 = vmul.f32 %v3384_v44, %v2863_v32  ;;  %v1359_v39 = vpack.c.bf16 %v1347_v43, %v1346_v58  ;;  %v1295_v37 = vmul.f32 %v2976_v22, %v1272_v46  ;;  %v1223_v30 = vmul.f32 %v3384_v44, %v1165_v34  ;;  %v3168_v43 = vld [vmem:[%s3295_s9] ss:$0 sm:$0xff] }
 0x173   : > { %v1258_v47 = vmul.f32 %v2261_v0, %v1134_v5  ;;  %v1349_v16 = vmin.f32 %v1333_v45, 6.0  ;;  %v1296_v3 = vmul.f32 %v2976_v22, %v1273_v57  ;;  %v1203_v33 = vadd.f32 %v1187_v6, %v1100_v27  ;;  %v1801_v27 = vld [vmem:[%s2122_s27 + $0x20] sm:$0xff]  ;;  %v1799_v57 = vld [vmem:[%s2122_s27 + $0x10] sm:$0xff] }
 0x174   : > { %v1238_v18 = vadd.f32 %v1222_v35, %v2963_v28  ;;  %v1169_v55 = vsel %vm1104_vm8, %v2951_v1, 0.0  ;;  %1909 = vmatmul.mubr.bf16.vlgmr.msra.gmra.mrb[0].mxu1 %v1359_v39  ;;  %v1318_v32 = vadd.f32 %v2986_v8, %v1295_v37  ;;  %v1259_v15 = vmul.f32 %v2261_v0, %v1167_v14  ;;  %v1802_v37 = vld [vmem:[%s2122_s27 + $0x28] sm:$0xff] }
 0x175   : > { %v1066_v7 = vadd.f32 %v3429_v31, %v2968_v59  ;;  %v1360_v24 = vpack.c.bf16 %v1349_v16, %v1348_v23  ;;  %v1319_v2 = vadd.f32 %v2986_v8, %v1296_v3  ;;  %v1239_v52 = vadd.f32 %v1223_v30, %v1203_v33  ;;  %v1800_v3 = vld [vmem:[%s2122_s27 + $0x18] sm:$0xff] }
 0x176   : > { %v1274_v50 = vadd.f32 %v1258_v47, %v1238_v18  ;;  %v1334_v21 = vmax.f32 %v1318_v32, 0.0  ;;  %v1189_v17 = vmul.f32 %v2232_v49, %v1165_v34  ;;  %v1224_v38 = vmul.f32 %v3384_v44, %v1134_v5 }
 0x177   : > { %v1102_v28 = vadd.f32 %v2926_v60, %v1066_v7  ;;  %1912 = vmatprep.mubr.bf16.mxu1 %v1360_v24  ;;  %v1335_v1 = vmax.f32 %v1319_v2, 0.0  ;;  %v1275_v13 = vadd.f32 %v1259_v15, %v1239_v52  ;;  %v1225_v58 = vmul.f32 %v3384_v44, %v1167_v14  ;;  %v1805_v24 = vld [vmem:[%s2122_s27 + $0x40] sm:$0xff] }
 0x178   : > { %v1297_v62 = vmul.f32 %v2976_v22, %v1274_v50  ;;  %v1350_v59 = vmin.f32 %v1334_v21, 6.0  ;;  %v1240_v29 = vadd.f32 %v1224_v38, %v3018_v9  ;;  %v1260_v25 = vmul.f32 %v2261_v0, %v2944_v19  ;;  %v1803_v21 = vld [vmem:[%s2122_s27 + $0x30] sm:$0xff] }
 0x179   : > { %v1205_v51 = vadd.f32 %v1189_v17, %v1102_v28  ;;  %v1351_v61 = vmin.f32 %v1335_v1, 6.0  ;;  %v1298_v60 = vmul.f32 %v2976_v22, %v1275_v13  ;;  %v1261_v36 = vmul.f32 %v2261_v0, %v1169_v55  ;;  %v1806_v1 = vld [vmem:[%s2122_s27 + $0x48] sm:$0xff] }
 0x17a   : > { %v1320_v49 = vadd.f32 %v2986_v8, %v1297_v62  ;;  %v1276_v11 = vadd.f32 %v1260_v25, %v1240_v29 }
 0x17b   : > { %v1241_v34 = vadd.f32 %v1225_v58, %v1205_v51  ;;  %v1361_v12 = vpack.c.bf16 %v1351_v61, %v1350_v59  ;;  %v1321_v63 = vadd.f32 %v2986_v8, %v1298_v60  ;;  %v1804_v59 = vld [vmem:[%s2122_s27 + $0x38] sm:$0xff] }
 0x17c   : > { %v1336_v44 = vmax.f32 %v1320_v49, 0.0  ;;  %v1299_v56 = vmul.f32 %v2976_v22, %v1276_v11 }
 0x17d   : > { %v1277_v20 = vadd.f32 %v1261_v36, %v1241_v34  ;;  %1913 = vmatmul.mubr.bf16.gmra.mrb[4].mxu1 %v1361_v12  ;;  %v1337_v19 = vmax.f32 %v1321_v63, 0.0  ;;  %v1809_v36 = vld [vmem:[%s2122_s27 + $0x60] sm:$0xff] }
 0x17e   : > { %v1352_v9 = vmin.f32 %v1336_v44, 6.0  ;;  %v1322_v40 = vadd.f32 %v2986_v8, %v1299_v56  ;;  %v1807_v44 = vld [vmem:[%s2122_s27 + $0x50] sm:$0xff] }
 0x17f   : > { %v1300_v53 = vmul.f32 %v2976_v22, %v1277_v20  ;;  %v1353_v23 = vmin.f32 %v1337_v19, 6.0  ;;  %v3163_v22 = vld [vmem:[%s3294_s8] ss:$0 sm:$0xff] }
 0x180   : > { %v1338_v26 = vmax.f32 %v1322_v40, 0.0 }
 0x181   : > { %v1323_v0 = vadd.f32 %v2986_v8, %v1300_v53  ;;  %v1362_v10 = vpack.c.bf16 %v1353_v23, %v1352_v9  ;;  %v1810_v9 = vld [vmem:[%s2122_s27 + $0x68] sm:$0xff] }
 0x182   : > { %v1354_v54 = vmin.f32 %v1338_v26, 6.0 }
 0x183   : > { %v1339_v4 = vmax.f32 %v1323_v0, 0.0  ;;  %1916 = vmatprep.mubr.bf16.mxu1 %v1362_v10  ;;  %v1808_v0 = vld [vmem:[%s2122_s27 + $0x58] sm:$0xff] }
 0x185   : > { %v1355_v41 = vmin.f32 %v1339_v4, 6.0 }
 0x187   : > { %v1363_v5 = vpack.c.bf16 %v1355_v41, %v1354_v54 }
 0x189   : > { %1917 = vmatmul.mubr.bf16.gmra.mrb[8].mxu1 %v1363_v5 }
 0x22f   : > { %v1906_v8 = vpop.f32.mrb[20].mxu0 }
 0x230   : > { %v1534_v46 = vmul.f32 %v1906_v8, %v3163_v22  ;;  %v1462_v42 = vpop.f32.mrb[21].mxu0 }
 0x231   : > { %v1532_v48 = vmul.f32 %v3163_v22, %v1462_v42  ;;  %v1907_v14 = vpop.f32.mrb[22].mxu0 }
 0x232   : > { %v1557_v45 = vadd.f32 %v3168_v43, %v1534_v46  ;;  %v1535_v6 = vmul.f32 %v1907_v14, %v3163_v22  ;;  %v1465_v35 = vpop.f32.mrb[23].mxu0  ;;  %v1813_v46 = vld [vmem:[%s2122_s27 + $0x80] sm:$0xff]  ;;  %v1811_v14 = vld [vmem:[%s2122_s27 + $0x70] sm:$0xff] }
 0x233   : > { %v1555_v39 = vadd.f32 %v3168_v43, %v1532_v48  ;;  %v1533_v30 = vmul.f32 %v3163_v22, %v1465_v35  ;;  %v1814_v35 = vld [vmem:[%s2122_s27 + $0x88] sm:$0xff] }
 0x234   : > { %1573 = vst [vmem:[%s3174_s30 + $0x10] sm:$0xff] %v1557_v45  ;;  %v1624_v47 = vadd.f32 %v1801_v27, %v1557_v45  ;;  %v1558_v16 = vadd.f32 %v3168_v43, %v1535_v6 }
 0x235   : > { %1571 = vst [vmem:[%s3174_s30] sm:$0xff] %v1555_v39  ;;  %v1622_v33 = vadd.f32 %v1799_v57, %v1555_v39  ;;  %v1556_v18 = vadd.f32 %v3168_v43, %v1533_v30 }
 0x236   : > { %1640 = vst.msk [vmem:[%s3174_s30 + $0x10] sm:$0xff] %vm410_vm1, %v1624_v47  ;;  %1574 = vst [vmem:[%s3174_s30 + $0x18] sm:$0xff] %v1558_v16  ;;  %v1625_v55 = vadd.f32 %v1802_v37, %v1558_v16  ;;  %v1812_v47 = vld [vmem:[%s2122_s27 + $0x78] sm:$0xff] }
 0x237   : > { %1638 = vst.msk [vmem:[%s3174_s30] sm:$0xff] %vm410_vm1, %v1622_v33  ;;  %1572 = vst [vmem:[%s3174_s30 + $0x8] sm:$0xff] %v1556_v18  ;;  %v1623_v32 = vadd.f32 %v1800_v3, %v1556_v18 }
 0x238   : > { %1641 = vst.msk [vmem:[%s3174_s30 + $0x18] sm:$0xff] %vm410_vm1, %v1625_v55 }
 0x239   : > { %1639 = vst.msk [vmem:[%s3174_s30 + $0x8] sm:$0xff] %vm410_vm1, %v1623_v32 }
 0x247   : > { %v1910_v15 = vpop.f32.mrb[0].mxu1 }
 0x248   : > { %v1538_v31 = vmul.f32 %v1910_v15, %v3163_v22  ;;  %v1478_v7 = vpop.f32.mrb[1].mxu1 }
 0x249   : > { %v1536_v2 = vmul.f32 %v3163_v22, %v1478_v7  ;;  %v1911_v52 = vpop.f32.mrb[2].mxu1 }
 0x24a   : > { %v1561_v50 = vadd.f32 %v3168_v43, %v1538_v31  ;;  %v1539_v28 = vmul.f32 %v1911_v52, %v3163_v22  ;;  %v1481_v17 = vpop.f32.mrb[3].mxu1 }
 0x24b   : > { %v1559_v38 = vadd.f32 %v3168_v43, %v1536_v2  ;;  %v1537_v13 = vmul.f32 %v3163_v22, %v1481_v17 }
 0x24c   : > { %1577 = vst [vmem:[%s3174_s30 + $0x30] sm:$0xff] %v1561_v50  ;;  %v1628_v62 = vadd.f32 %v1805_v24, %v1561_v50  ;;  %v1562_v58 = vadd.f32 %v3168_v43, %v1539_v28 }
 0x24d   : > { %1575 = vst [vmem:[%s3174_s30 + $0x20] sm:$0xff] %v1559_v38  ;;  %v1626_v51 = vadd.f32 %v1803_v21, %v1559_v38  ;;  %v1560_v29 = vadd.f32 %v3168_v43, %v1537_v13 }
 0x24e   : > { %1644 = vst.msk [vmem:[%s3174_s30 + $0x30] sm:$0xff] %vm410_vm1, %v1628_v62  ;;  %1578 = vst [vmem:[%s3174_s30 + $0x38] sm:$0xff] %v1562_v58  ;;  %v1629_v25 = vadd.f32 %v1806_v1, %v1562_v58 }
 0x24f   : > { %1642 = vst.msk [vmem:[%s3174_s30 + $0x20] sm:$0xff] %vm410_vm1, %v1626_v51  ;;  %1576 = vst [vmem:[%s3174_s30 + $0x28] sm:$0xff] %v1560_v29  ;;  %v1627_v61 = vadd.f32 %v1804_v59, %v1560_v29 }
 0x250   : > { %1645 = vst.msk [vmem:[%s3174_s30 + $0x38] sm:$0xff] %vm410_vm1, %v1629_v25  ;;  %v1914_v60 = vpop.f32.mrb[4].mxu1 }
 0x251   : > { %1643 = vst.msk [vmem:[%s3174_s30 + $0x28] sm:$0xff] %vm410_vm1, %v1627_v61  ;;  %v1542_v49 = vmul.f32 %v1914_v60, %v3163_v22  ;;  %v1494_v34 = vpop.f32.mrb[5].mxu1 }
 0x252   : > { %v1540_v11 = vmul.f32 %v3163_v22, %v1494_v34  ;;  %v1915_v12 = vpop.f32.mrb[6].mxu1 }
 0x253   : > { %v1565_v63 = vadd.f32 %v3168_v43, %v1542_v49  ;;  %v1543_v20 = vmul.f32 %v1915_v12, %v3163_v22  ;;  %v1497_v56 = vpop.f32.mrb[7].mxu1 }
 0x254   : > { %v1563_v19 = vadd.f32 %v3168_v43, %v1540_v11  ;;  %v1541_v53 = vmul.f32 %v3163_v22, %v1497_v56 }
 0x255   : > { %1581 = vst [vmem:[%s3174_s30 + $0x50] sm:$0xff] %v1565_v63  ;;  %v1632_v40 = vadd.f32 %v1809_v36, %v1565_v63  ;;  %v1566_v23 = vadd.f32 %v3168_v43, %v1543_v20 }
 0x256   : > { %1579 = vst [vmem:[%s3174_s30 + $0x40] sm:$0xff] %v1563_v19  ;;  %v1630_v26 = vadd.f32 %v1807_v44, %v1563_v19  ;;  %v1564_v10 = vadd.f32 %v3168_v43, %v1541_v53 }
 0x257   : > { %1648 = vst.msk [vmem:[%s3174_s30 + $0x50] sm:$0xff] %vm410_vm1, %v1632_v40  ;;  %1582 = vst [vmem:[%s3174_s30 + $0x58] sm:$0xff] %v1566_v23  ;;  %v1633_v4 = vadd.f32 %v1810_v9, %v1566_v23 }
 0x258   : > { %1646 = vst.msk [vmem:[%s3174_s30 + $0x40] sm:$0xff] %vm410_vm1, %v1630_v26  ;;  %1580 = vst [vmem:[%s3174_s30 + $0x48] sm:$0xff] %v1564_v10  ;;  %v1631_v54 = vadd.f32 %v1808_v0, %v1564_v10 }
 0x259   : > { %1649 = vst.msk [vmem:[%s3174_s30 + $0x58] sm:$0xff] %vm410_vm1, %v1633_v4 }
 0x25a   : > { %1647 = vst.msk [vmem:[%s3174_s30 + $0x48] sm:$0xff] %vm410_vm1, %v1631_v54 }
 0x25c   : > { %v1918_v41 = vpop.f32.mrb[8].mxu1 }
 0x25d   : > { %v1546_v5 = vmul.f32 %v1918_v41, %v3163_v22  ;;  %v1510_v8 = vpop.f32.mrb[9].mxu1 }
 0x25e   : > { %v1544_v42 = vmul.f32 %v3163_v22, %v1510_v8  ;;  %v1919_v27 = vpop.f32.mrb[10].mxu1 }
 0x25f   : > { %v1569_v48 = vadd.f32 %v3168_v43, %v1546_v5  ;;  %v1547_v45 = vmul.f32 %v1919_v27, %v3163_v22  ;;  %v1513_v57 = vpop.f32.mrb[11].mxu1 }
 0x260   : > { %v1567_v6 = vadd.f32 %v3168_v43, %v1544_v42  ;;  %v1545_v39 = vmul.f32 %v3163_v22, %v1513_v57 }
 0x261   : > { %1585 = vst [vmem:[%s3174_s30 + $0x70] sm:$0xff] %v1569_v48  ;;  %v1636_v37 = vadd.f32 %v1813_v46, %v1569_v48  ;;  %v1570_v30 = vadd.f32 %v3168_v43, %v1547_v45 }
 0x262   : > { %1583 = vst [vmem:[%s3174_s30 + $0x60] sm:$0xff] %v1567_v6  ;;  %v1634_v16 = vadd.f32 %v1811_v14, %v1567_v6  ;;  %v1568_v3 = vadd.f32 %v3168_v43, %v1545_v39 }
 0x263   : > { %1652 = vst.msk [vmem:[%s3174_s30 + $0x70] sm:$0xff] %vm410_vm1, %v1636_v37  ;;  %1586 = vst [vmem:[%s3174_s30 + $0x78] sm:$0xff] %v1570_v30  ;;  %v1637_v33 = vadd.f32 %v1814_v35, %v1570_v30 }
 0x264   : > { %1650 = vst.msk [vmem:[%s3174_s30 + $0x60] sm:$0xff] %vm410_vm1, %v1634_v16  ;;  %1584 = vst [vmem:[%s3174_s30 + $0x68] sm:$0xff] %v1568_v3  ;;  %v1635_v18 = vadd.f32 %v1812_v47, %v1568_v3 }
 0x265   : > { %1653 = vst.msk [vmem:[%s3174_s30 + $0x78] sm:$0xff] %vm410_vm1, %v1637_v33 }
 0x266   : > { %1651 = vst.msk [vmem:[%s3174_s30 + $0x68] sm:$0xff] %vm410_vm1, %v1635_v18 }
 0x267 PF: > { %s20_s17 = sadd.s32 1, %s2023_s17   ;;  %s3430_s13 = smov %s2015_s15 }
 0x268   : > { %p17_p7 = scmp.ge.s32.totalorder %s20_s17, 6   ;;  %s3431_s14 = smov %s2019_s16 }
 0x269   : > { %s3432_s15 = smov %s3435_s18  ;;  %s3433_s16 = smov %s3439_s19 }
 0x26a   :  { %19 = sbr.rel (!%p17_p7) target bundleno = 3 (0x3), region = 92 }

</bundles_post_ra>
